<compile_context>
chip_gen: v6e
topology: v6e:2x2x1
jax: 0.10.0
libtpu: 0.0.40
codegen_flags: <defaults>
</compile_context>

<pallas_src>
import functools
import math

import jax
import jax.numpy as jnp
import numpy as np
from jax.experimental import pallas as pl
from jax.experimental.pallas import tpu as pltpu

EPS = 1e-5
LANE = 128


# ------------------------------ small helpers -------------------------------

def _round_up(v, m):
    return (v + m - 1) // m * m


def _tpu_vmem_limit_bytes():
    """Generation-aware VMEM limit: ~3/4 of physical (96 MiB on 128-MiB v5e/v6e,
    48 MiB on v7x's 64-MiB TensorCores); conservative default if unknown."""
    cap = 64 * 1024 * 1024
    try:
        info = pltpu.get_tpu_info()
        cap = int(info.vmem_capacity_bytes) or cap
    except Exception:
        pass
    return int(min(cap * 3 // 4, 112 * 1024 * 1024))


def _pick_batch_block(n, per_batch_bytes, budget_bytes):
    """Largest divisor of n whose blocks fit the VMEM budget; prefer an even
    number of grid steps (>= 2) so both v7x TensorCores get balanced work."""
    # TODO(synk): add an L_out tiling axis (halo via extra tap reads) so long
    # sequences / prime batch sizes still get VMEM-fitting, lane-dense tiles.
    divs = [d for d in range(1, n + 1) if n % d == 0]
    fits = [d for d in divs if d * per_batch_bytes <= budget_bytes] or [1]
    even_multi = [d for d in fits if (n // d) >= 2 and (n // d) % 2 == 0]
    multi = [d for d in fits if (n // d) >= 2]
    pool = even_multi or multi or fits
    return max(pool)


def _cost(flops, inputs, out_shapes):
    nbytes = 0
    for a in list(inputs) + list(out_shapes):
        nbytes += math.prod(a.shape) * np.dtype(a.dtype).itemsize
    return pl.CostEstimate(flops=int(flops), transcendentals=0,
                           bytes_accessed=int(nbytes))


# ---------------------------- in-kernel helpers ------------------------------

def _shift_rows(x, direction):
    """Shifted view along L: direction=+1 -> row i holds x[i-1] (row 0 zero),
    direction=-1 -> row i holds x[i+1] (last row zero)."""
    # TODO(synk): switch to pltpu.roll(axis=1) + iota masking (XLU slot) once
    # sublane rolls of packed dtypes are validated on every target generation.
    nb, l, c = x.shape
    z = jnp.zeros((nb, 1, c), x.dtype)
    if direction > 0:
        return jnp.concatenate([z, x[:, :l - 1, :]], axis=1)
    return jnp.concatenate([x[:, 1:, :], z], axis=1)


def _store_and_stats(y2d, y_ref, st_ref):
    """Store the conv output tile and per-tile BN partial statistics
    [sum, centred sum-of-squares], computed on the stored (rounded) values."""
    yr = y2d.astype(y_ref.dtype)
    y_ref[...] = yr.reshape(y_ref.shape)
    yf = yr.astype(jnp.float32)
    s = jnp.sum(yf, axis=0, keepdims=True)                 # (1, C)
    d = yf - s / yf.shape[0]
    css = jnp.sum(d * d, axis=0, keepdims=True)            # (1, C)
    st_ref[...] = jnp.concatenate([s, css], axis=0).reshape(st_ref.shape)


# -------------------------------- kernels ------------------------------------

def _phase_a_kernel(x_ref, wl_ref, wc_ref, wr_ref, *out_refs,
                    has_shortcut, stride, l_out):
    # conv1 (k=3, pad=1, stride) [+ fused 1x1 shortcut conv] + BN partial stats.
    if has_shortcut:
        y1_ref, st1_ref, ysc_ref, stsc_ref = out_refs
    else:
        y1_ref, st1_ref = out_refs

    if stride == 1:
        center = x_ref[...]                                 # (nb, L, Cin_p)
        left = _shift_rows(center, +1)                      # x[l-1]
        right = _shift_rows(center, -1)                     # x[l+1]
    else:
        # In-kernel strided tap gather from the once-padded input: VMEM and
        # FLOPs scale with L_out, and no pre-gathered 3x array hits HBM.
        left = x_ref[:, pl.ds(0, l_out, stride), :]
        center = x_ref[:, pl.ds(1, l_out, stride), :]
        right = x_ref[:, pl.ds(2, l_out, stride), :]

    nb, lo, cin = center.shape
    m = nb * lo
    # Centre tap: N is 2*cout_p when the shortcut is fused in, so the MXU
    # columns that would idle at N=128 on v6e/v7x produce ysc for free.
    yc = jnp.dot(center.reshape(m, cin), wc_ref[...],
                 preferred_element_type=jnp.float32)
    if has_shortcut:
        cout = yc.shape[1] // 2
        y1, ysc = yc[:, :cout], yc[:, cout:]
    else:
        y1 = yc
    y1 = y1 + jnp.dot(left.reshape(m, cin), wl_ref[...],
                      preferred_element_type=jnp.float32)
    y1 = y1 + jnp.dot(right.reshape(m, cin), wr_ref[...],
                      preferred_element_type=jnp.float32)
    _store_and_stats(y1, y1_ref, st1_ref)
    if has_shortcut:
        _store_and_stats(ysc, ysc_ref, stsc_ref)


def _phase_b_kernel(y1_ref, wl_ref, wc_ref, wr_ref, scale_ref, shift_ref,
                    y2_ref, st2_ref, *, compute_dtype):
    # bn1 (folded scale/shift) + relu + conv2 (k=3, pad=1, s=1) + BN stats.
    y1 = y1_ref[...].astype(jnp.float32)
    a1 = jnp.maximum(y1 * scale_ref[...][None] + shift_ref[...][None], 0.0)
    a1 = a1.astype(compute_dtype)
    left = _shift_rows(a1, +1)
    right = _shift_rows(a1, -1)
    nb, lo, c = a1.shape
    m = nb * lo
    y2 = jnp.dot(a1.reshape(m, c), wc_ref[...],
                 preferred_element_type=jnp.float32)
    y2 = y2 + jnp.dot(left.reshape(m, c), wl_ref[...],
                      preferred_element_type=jnp.float32)
    y2 = y2 + jnp.dot(right.reshape(m, c), wr_ref[...],
                      preferred_element_type=jnp.float32)
    _store_and_stats(y2, y2_ref, st2_ref)


def _phase_c_kernel(y2_ref, res_ref, scale2_ref, shift2_ref, *rest,
                    has_shortcut):
    # bn2 + (bn_sc(shortcut conv) | identity) + residual add + relu.
    if has_shortcut:
        scale_sc_ref, shift_sc_ref, o_ref = rest
    else:
        (o_ref,) = rest
    out = y2_ref[...].astype(jnp.float32) * scale2_ref[...][None] \
        + shift2_ref[...][None]
    res = res_ref[...].astype(jnp.float32)
    if has_shortcut:
        res = res * scale_sc_ref[...][None] + shift_sc_ref[...][None]
    o_ref[...] = jnp.maximum(out + res, 0.0).astype(o_ref.dtype)


# ------------------------------ JAX wrappers ---------------------------------

def basic_block_1d_nlc(x_nlc, params, *, stride=1,
                       compute_dtype=jnp.bfloat16, out_dtype=None,
                       unpad_output=False, vmem_limit_bytes=None):
    """x_nlc: (N, L, C_in) or already lane-padded (N, L, Cin_p) with zero
    padded lanes.  Returns a lane-padded (N, L_out, Cout_p) array (padded lanes
    are exactly zero) in out_dtype (defaults to compute_dtype), unless
    unpad_output=True.  params follow PyTorch conventions."""
    w1, w2, w_sc, g1, b1, g2, b2, g_sc, b_sc = params
    f32 = jnp.float32
    out_dtype = compute_dtype if out_dtype is None else out_dtype
    n, l = x_nlc.shape[0], x_nlc.shape[1]
    c_out, c_in = w1.shape[0], w1.shape[1]
    has_shortcut = (stride != 1) or (c_in != c_out)
    hs = 1 if has_shortcut else 0
    l_out = (l - 1) // stride + 1                      # PyTorch conv length
    # NOTE: lane-padding small channel counts to 128 inflates MXU work and HBM
    # bytes by up to cout_p / c_out; pick real channel counts accordingly.
    cin_p = _round_up(c_in, LANE)
    cout_p = _round_up(c_out, LANE)

    # ---- layout glue (XLA): lane-pad channels (skipped when pre-padded) -----
    x_c = x_nlc.astype(compute_dtype)
    if stride == 1:
        if x_nlc.shape[-1] == cin_p:
            x_in = x_c                                 # already lane-padded
        else:
            x_in = jnp.zeros((n, l, cin_p), compute_dtype)
            x_in = x_in.at[:, :, :c_in].set(x_c)
    else:
        # One zero-padded copy (left halo + strided-read slack); the 3 taps are
        # gathered in-kernel with strided reads.
        l_pad = max((l_out - 1) * stride + 3, l + 1)
        src_c = x_nlc.shape[-1]
        x_in = jnp.zeros((n, l_pad, cin_p), compute_dtype)
        x_in = x_in.at[:, 1:l + 1, :src_c].set(x_c)

    # ---- fold conv weights per tap: (Cout, Ci, K) -> (Ci_p, Cout_p) ---------
    def fold_tap(w, k, ci, ci_p):
        wt = w[:, :, k].astype(f32).T                  # (Ci, Cout)
        return (jnp.zeros((ci_p, cout_p), f32).at[:ci, :c_out].set(wt)
                .astype(compute_dtype))

    w1_l = fold_tap(w1, 0, c_in, cin_p)
    w1_c = fold_tap(w1, 1, c_in, cin_p)
    w1_r = fold_tap(w1, 2, c_in, cin_p)
    if has_shortcut:
        # Fuse the 1x1 shortcut conv into conv1's centre-tap matmul along N.
        w1_c = jnp.concatenate([w1_c, fold_tap(w_sc, 0, c_in, cin_p)], axis=1)
    w2_l = fold_tap(w2, 0, c_out, cout_p)
    w2_c = fold_tap(w2, 1, c_out, cout_p)
    w2_r = fold_tap(w2, 2, c_out, cout_p)

    def pad_gb(g, b):
        gp = jnp.ones((cout_p,), f32).at[:c_out].set(g.astype(f32))
        bp = jnp.zeros((cout_p,), f32).at[:c_out].set(b.astype(f32))
        return gp, bp

    count = n * l_out

    # ---- batch tile: honest per-batch VMEM estimate, generation-aware limit --
    itm = np.dtype(compute_dtype).itemsize
    otm = np.dtype(out_dtype).itemsize
    act = l_out * cout_p
    l_in_rows = x_in.shape[1]
    tap_rows = l if stride == 1 else l_out
    phase_a_b = (2 * l_in_rows * cin_p * itm           # double-buffered input
                 + 2 * (1 + hs) * act * itm            # double-buffered y1/ysc
                 + 2 * tap_rows * cin_p * itm          # shifted-tap copies
                 + (1 + hs) * act * 4 + act * 8)       # f32 acc + stats temps
    phase_b_b = (4 * act * itm                         # db y1 in / y2 out
                 + act * 4 + 3 * act * itm             # a1 f32 + a1/left/right
                 + act * 4 + act * 8)                  # f32 acc + stats temps
    phase_c_b = 2 * (2 * act * itm + act * otm) + 2 * act * 4
    per_b = max(phase_a_b, phase_b_b, phase_c_b)
    w_bytes = int(w1_l.size + w1_c.size + w1_r.size
                  + w2_l.size + w2_c.size + w2_r.size) * itm
    vmem_limit = int(vmem_limit_bytes or _tpu_vmem_limit_bytes())
    budget = max(vmem_limit - 2 * w_bytes - 4 * 1024 * 1024, per_b)
    nb = _pick_batch_block(n, per_b, budget)
    grid = (n // nb,)
    num_tiles = grid[0]
    tile_count = nb * l_out

    cparams = pltpu.CompilerParams(dimension_semantics=("parallel",),
                                   vmem_limit_bytes=vmem_limit)

    def fold_bn(st, g, b):
        # st: (num_tiles, 2, Cp) = [tile sum, tile centred sumsq]; Chan-style
        # combine in XLA (robust vs. global E[x^2]-E[x]^2 cancellation).
        gp, bp = pad_gb(g, b)
        sums, css = st[:, 0, :], st[:, 1, :]
        mean = jnp.sum(sums, axis=0) / count
        tmean = sums / tile_count
        var = (jnp.sum(css, axis=0)
               + tile_count * jnp.sum((tmean - mean) ** 2, axis=0)) / count
        var = jnp.maximum(var, 0.0)
        scale = gp * jax.lax.rsqrt(var + EPS)
        shift = bp - mean * scale
        return scale.reshape(1, cout_p), shift.reshape(1, cout_p)

    x_spec = pl.BlockSpec((nb,) + tuple(x_in.shape[1:]), lambda i: (i, 0, 0))
    act_spec = pl.BlockSpec((nb, l_out, cout_p), lambda i: (i, 0, 0))
    st_spec = pl.BlockSpec((1, 2, cout_p), lambda i: (i, 0, 0))
    vec_spec = pl.BlockSpec((1, cout_p), lambda i: (0, 0))
    act_shape = jax.ShapeDtypeStruct((n, l_out, cout_p), compute_dtype)
    st_shape = jax.ShapeDtypeStruct((num_tiles, 2, cout_p), jnp.float32)

    def wspec(w):
        return pl.BlockSpec(tuple(w.shape), lambda i: (0, 0))

    # ---------------- phase A: conv1 (+ fused shortcut) + stats ---------------
    a_inputs = [x_in, w1_l, w1_c, w1_r]
    a_specs = [x_spec, wspec(w1_l), wspec(w1_c), wspec(w1_r)]
    a_out_shape = [act_shape, st_shape]
    a_out_specs = [act_spec, st_spec]
    if has_shortcut:
        a_out_shape += [act_shape, st_shape]
        a_out_specs += [act_spec, st_spec]
    flops_a = 2 * n * l_out * cin_p * (3 + hs) * cout_p
    a_out = pl.pallas_call(
        functools.partial(_phase_a_kernel, has_shortcut=has_shortcut,
                          stride=stride, l_out=l_out),
        grid=grid, in_specs=a_specs,
        out_specs=tuple(a_out_specs), out_shape=tuple(a_out_shape),
        compiler_params=cparams,
        cost_estimate=_cost(flops_a, a_inputs, a_out_shape),
    )(*a_inputs)
    if has_shortcut:
        y1, st1, ysc, stsc = a_out
    else:
        y1, st1 = a_out

    scale1, shift1 = fold_bn(st1, g1, b1)

    # ---------------- phase B: bn1 + relu + conv2 + stats ---------------------
    b_inputs = [y1, w2_l, w2_c, w2_r, scale1, shift1]
    b_specs = [act_spec, wspec(w2_l), wspec(w2_c), wspec(w2_r),
               vec_spec, vec_spec]
    y2, st2 = pl.pallas_call(
        functools.partial(_phase_b_kernel, compute_dtype=compute_dtype),
        grid=grid, in_specs=b_specs,
        out_specs=(act_spec, st_spec), out_shape=(act_shape, st_shape),
        compiler_params=cparams,
        cost_estimate=_cost(2 * n * l_out * 3 * cout_p * cout_p + 5 * n * act,
                            b_inputs, (act_shape, st_shape)),
    )(*b_inputs)

    scale2, shift2 = fold_bn(st2, g2, b2)

    # ------------- phase C: bn2 + shortcut bn/identity + add + relu -----------
    res = ysc if has_shortcut else x_in   # identity => stride==1, cin_p==cout_p
    c_inputs = [y2, res, scale2, shift2]
    c_specs = [act_spec, act_spec, vec_spec, vec_spec]
    if has_shortcut:
        scale_sc, shift_sc = fold_bn(stsc, g_sc, b_sc)
        c_inputs += [scale_sc, shift_sc]
        c_specs += [vec_spec, vec_spec]
    out_shape = jax.ShapeDtypeStruct((n, l_out, cout_p), out_dtype)
    # compute_dtype output halves the phase-C write traffic; alias onto y2
    # (same shape/dtype) so XLA reuses the buffer.
    aliases = {0: 0} if np.dtype(out_dtype) == np.dtype(compute_dtype) else {}
    out_p = pl.pallas_call(
        functools.partial(_phase_c_kernel, has_shortcut=has_shortcut),
        grid=grid, in_specs=c_specs,
        out_specs=act_spec, out_shape=out_shape,
        compiler_params=cparams,
        input_output_aliases=aliases,
        cost_estimate=_cost(8 * n * act, c_inputs, (out_shape,)),
    )(*c_inputs)

    return out_p[:, :, :c_out] if unpad_output else out_p


def basic_block_1d(x_ncl, params, *, stride=1, compute_dtype=jnp.bfloat16,
                   out_dtype=None):
    """PyTorch-layout boundary: (N, C, L) in / out.  Prefer basic_block_1d_nlc
    and keep activations NLC + lane-padded across blocks to avoid per-block
    HBM transposes and pad/slice round trips."""
    c_out = params[0].shape[0]
    out_nlc = basic_block_1d_nlc(jnp.transpose(x_ncl, (0, 2, 1)), params,
                                 stride=stride, compute_dtype=compute_dtype,
                                 out_dtype=out_dtype)
    return jnp.transpose(out_nlc[:, :, :c_out], (0, 2, 1))


# --------------------------- pure-JAX reference ------------------------------

def _ref_basic_block(x, params, stride, operand_dtype=jnp.float32):
    # Training-mode BasicBlock1D.  operand_dtype emulates the kernel's MXU
    # operand precision (bf16 operands / f32 accumulation); f32 == exact module.
    w1, w2, w_sc, g1, b1, g2, b2, g_sc, b_sc = params
    od = operand_dtype
    f32 = jnp.float32
    x = x.astype(od).astype(f32)

    def conv(inp, w, s):
        pad = 1 if w.shape[-1] == 3 else 0
        y = jax.lax.conv_general_dilated(
            inp.astype(od), w.astype(od), window_strides=(s,),
            padding=[(pad, pad)], dimension_numbers=('NCH', 'OIH', 'NCH'),
            preferred_element_type=f32)
        return y.astype(od).astype(f32)     # intermediates are stored in od

    def bn(y, g, b):
        m = y.mean(axis=(0, 2), keepdims=True)
        v = ((y - m) ** 2).mean(axis=(0, 2), keepdims=True)
        return (y - m) / jnp.sqrt(v + EPS) * g[None, :, None] + b[None, :, None]

    out = jax.nn.relu(bn(conv(x, w1, stride), g1, b1))
    out = bn(conv(out, w2, 1), g2, b2)
    c_in, c_out = x.shape[1], w1.shape[0]
    if stride != 1 or c_in != c_out:
        sc = bn(conv(x, w_sc, stride), g_sc, b_sc)
    else:
        sc = x
    return jax.nn.relu(out + sc)


# ----------------------------------- main ------------------------------------

if __name__ == "__main__":
    def make_params(key, c_in, c_out):
        ks = jax.random.split(key, 9)
        return (0.2 * jax.random.normal(ks[0], (c_out, c_in, 3), jnp.float32),
                0.2 * jax.random.normal(ks[1], (c_out, c_out, 3), jnp.float32),
                0.2 * jax.random.normal(ks[2], (c_out, c_in, 1), jnp.float32),
                1.0 + 0.1 * jax.random.normal(ks[3], (c_out,), jnp.float32),
                0.1 * jax.random.normal(ks[4], (c_out,), jnp.float32),
                1.0 + 0.1 * jax.random.normal(ks[5], (c_out,), jnp.float32),
                0.1 * jax.random.normal(ks[6], (c_out,), jnp.float32),
                1.0 + 0.1 * jax.random.normal(ks[7], (c_out,), jnp.float32),
                0.1 * jax.random.normal(ks[8], (c_out,), jnp.float32))

    key = jax.random.PRNGKey(0)
    configs = [
        # (name,                N, Cin, Cout, L,  s, compute_dtype, rel tol)
        ("conv_shortcut_bf16",  8, 4,   8,    16, 1, jnp.bfloat16, 2e-2),
        ("conv_shortcut_f32",   8, 4,   8,    16, 1, jnp.float32,  2e-4),
        ("stride2_oddL_f32",    4, 4,   8,    15, 2, jnp.float32,  2e-4),
        ("identity_f32",        8, 8,   8,    16, 1, jnp.float32,  2e-4),
    ]
    for name, n, ci, co, l, s, cd, tol in configs:
        kx, kp, key = jax.random.split(key, 3)
        x = jax.random.normal(kx, (n, ci, l), jnp.float32)
        params = make_params(kp, ci, co)
        fn = jax.jit(functools.partial(basic_block_1d, stride=s,
                                       compute_dtype=cd))
        out = jax.block_until_ready(fn(x, params))
        ref = _ref_basic_block(x, params, s, operand_dtype=cd)
        assert out.shape == ref.shape, (name, out.shape, ref.shape)
        err = float(jnp.max(jnp.abs(out.astype(jnp.float32) - ref)
                            / (1.0 + jnp.abs(ref))))
        if err > tol:
            raise AssertionError(f"{name}: max rel err {err} > {tol}")
    print("KERNEL_OK")
</pallas_src>

<mosaic_0001>
module attributes {stable_mosaic.version = 11 : i64} {
  func.func @_phase_a_kernel(%arg0: i32, %arg1: memref<4x16x128xbf16, #tpu.memory_space<vmem>>, %arg2: memref<128x128xbf16, #tpu.memory_space<vmem>>, %arg3: memref<128x256xbf16, #tpu.memory_space<vmem>>, %arg4: memref<128x128xbf16, #tpu.memory_space<vmem>>, %arg5: memref<4x16x128xbf16, #tpu.memory_space<vmem>>, %arg6: memref<1x2x128xf32, #tpu.memory_space<vmem>>, %arg7: memref<4x16x128xbf16, #tpu.memory_space<vmem>>, %arg8: memref<1x2x128xf32, #tpu.memory_space<vmem>>) attributes {dimension_semantics = [#tpu.dimension_semantics<parallel>], iteration_bounds = array<i64: 2>, scalar_prefetch = 0 : i64, scratch_operands = 0 : i64, tpu.core_type = #tpu.core_type<tc>, window_params = [{transform_indices = @transform_0, window_bounds = array<i64: 4, 16, 128>}, {pipeline_mode = #tpu.pipeline_mode<synchronous>, transform_indices = @transform_1, window_bounds = array<i64: 128, 128>}, {pipeline_mode = #tpu.pipeline_mode<synchronous>, transform_indices = @transform_2, window_bounds = array<i64: 128, 256>}, {pipeline_mode = #tpu.pipeline_mode<synchronous>, transform_indices = @transform_3, window_bounds = array<i64: 128, 128>}, {transform_indices = @transform_4, window_bounds = array<i64: 4, 16, 128>}, {transform_indices = @transform_5, window_bounds = array<i64: 1, 2, 128>}, {transform_indices = @transform_6, window_bounds = array<i64: 4, 16, 128>}, {transform_indices = @transform_7, window_bounds = array<i64: 1, 2, 128>}]} {
    %c0 = arith.constant 0 : index
    %c0_0 = arith.constant 0 : index
    %c0_1 = arith.constant 0 : index
    %0 = vector.load %arg1[%c0, %c0_0, %c0_1] : memref<4x16x128xbf16, #tpu.memory_space<vmem>>, vector<4x16x128xbf16>
    %cst = arith.constant 0.000000e+00 : bf16
    %1 = vector.broadcast %cst : bf16 to vector<4x1x128xbf16>
    %2 = vector.extract_strided_slice %0 {offsets = [0, 0, 0], sizes = [4, 15, 128], strides = [1, 1, 1]} : vector<4x16x128xbf16> to vector<4x15x128xbf16>
    %3 = tpu.concatenate %1, %2 in 1 : vector<4x1x128xbf16>, vector<4x15x128xbf16> -> vector<4x16x128xbf16>
    %cst_2 = arith.constant 0.000000e+00 : bf16
    %4 = vector.broadcast %cst_2 : bf16 to vector<4x1x128xbf16>
    %5 = vector.extract_strided_slice %0 {offsets = [0, 1, 0], sizes = [4, 15, 128], strides = [1, 1, 1]} : vector<4x16x128xbf16> to vector<4x15x128xbf16>
    %6 = tpu.concatenate %5, %4 in 1 : vector<4x15x128xbf16>, vector<4x1x128xbf16> -> vector<4x16x128xbf16>
    %7 = vector.shape_cast %0 : vector<4x16x128xbf16> to vector<64x128xbf16>
    %c0_3 = arith.constant 0 : index
    %c0_4 = arith.constant 0 : index
    %8 = vector.load %arg3[%c0_3, %c0_4] : memref<128x256xbf16, #tpu.memory_space<vmem>>, vector<128x256xbf16>
    %cst_5 = arith.constant dense<0.000000e+00> : vector<64x256xf32>
    %9 = tpu.matmul %7, %8, %cst_5 {dimension_numbers = #tpu.dot_dimension_numbers<[1], [0], [0], [1], [0, 0, 1, 1], [], []>} : vector<64x128xbf16>, vector<128x256xbf16>, vector<64x256xf32> -> vector<64x256xf32>
    %10 = vector.extract_strided_slice %9 {offsets = [0, 0], sizes = [64, 128], strides = [1, 1]} : vector<64x256xf32> to vector<64x128xf32>
    %11 = vector.extract_strided_slice %9 {offsets = [0, 128], sizes = [64, 128], strides = [1, 1]} : vector<64x256xf32> to vector<64x128xf32>
    %12 = vector.shape_cast %3 : vector<4x16x128xbf16> to vector<64x128xbf16>
    %c0_6 = arith.constant 0 : index
    %c0_7 = arith.constant 0 : index
    %13 = vector.load %arg2[%c0_6, %c0_7] : memref<128x128xbf16, #tpu.memory_space<vmem>>, vector<128x128xbf16>
    %cst_8 = arith.constant dense<0.000000e+00> : vector<64x128xf32>
    %14 = tpu.matmul %12, %13, %cst_8 {dimension_numbers = #tpu.dot_dimension_numbers<[1], [0], [0], [1], [0, 0, 1, 1], [], []>} : vector<64x128xbf16>, vector<128x128xbf16>, vector<64x128xf32> -> vector<64x128xf32>
    %15 = arith.addf %10, %14 : vector<64x128xf32>
    %16 = vector.shape_cast %6 : vector<4x16x128xbf16> to vector<64x128xbf16>
    %c0_9 = arith.constant 0 : index
    %c0_10 = arith.constant 0 : index
    %17 = vector.load %arg4[%c0_9, %c0_10] : memref<128x128xbf16, #tpu.memory_space<vmem>>, vector<128x128xbf16>
    %cst_11 = arith.constant dense<0.000000e+00> : vector<64x128xf32>
    %18 = tpu.matmul %16, %17, %cst_11 {dimension_numbers = #tpu.dot_dimension_numbers<[1], [0], [0], [1], [0, 0, 1, 1], [], []>} : vector<64x128xbf16>, vector<128x128xbf16>, vector<64x128xf32> -> vector<64x128xf32>
    %19 = arith.addf %15, %18 : vector<64x128xf32>
    %20 = arith.truncf %19 : vector<64x128xf32> to vector<64x128xbf16>
    %21 = vector.shape_cast %20 : vector<64x128xbf16> to vector<4x16x128xbf16>
    %c0_12 = arith.constant 0 : index
    %c0_13 = arith.constant 0 : index
    %c0_14 = arith.constant 0 : index
    %22 = vector.load %arg5[%c0_12, %c0_13, %c0_14] : memref<4x16x128xbf16, #tpu.memory_space<vmem>>, vector<4x16x128xbf16>
    tpu.vector_store %arg5[%c0_12, %c0_13, %c0_14], %21 {strides = array<i32>} : memref<4x16x128xbf16, #tpu.memory_space<vmem>>, vector<4x16x128xbf16>,
    %23 = arith.extf %20 : vector<64x128xbf16> to vector<64x128xf32>
    %cst_15 = arith.constant dense<0.000000e+00> : vector<128xf32>
    %24 = vector.multi_reduction <add>, %23, %cst_15 [0] : vector<64x128xf32> to vector<128xf32>
    %25 = vector.shape_cast %24 : vector<128xf32> to vector<1x128xf32>
    %cst_16 = arith.constant 6.400000e+01 : f32
    %26 = vector.broadcast %cst_16 : f32 to vector<1x128xf32>
    %27 = arith.divf %25, %26 : vector<1x128xf32>
    %28 = vector.broadcast %27 : vector<1x128xf32> to vector<64x128xf32>
    %29 = arith.subf %23, %28 : vector<64x128xf32>
    %30 = arith.mulf %29, %29 : vector<64x128xf32>
    %cst_17 = arith.constant dense<0.000000e+00> : vector<128xf32>
    %31 = vector.multi_reduction <add>, %30, %cst_17 [0] : vector<64x128xf32> to vector<128xf32>
    %32 = vector.shape_cast %31 : vector<128xf32> to vector<1x128xf32>
    %33 = tpu.concatenate %25, %32 in 0 : vector<1x128xf32>, vector<1x128xf32> -> vector<2x128xf32>
    %34 = vector.shape_cast %33 : vector<2x128xf32> to vector<1x2x128xf32>
    %c0_18 = arith.constant 0 : index
    %c0_19 = arith.constant 0 : index
    %c0_20 = arith.constant 0 : index
    %35 = vector.load %arg6[%c0_18, %c0_19, %c0_20] : memref<1x2x128xf32, #tpu.memory_space<vmem>>, vector<1x2x128xf32>
    tpu.vector_store %arg6[%c0_18, %c0_19, %c0_20], %34 {strides = array<i32>} : memref<1x2x128xf32, #tpu.memory_space<vmem>>, vector<1x2x128xf32>,
    %36 = arith.truncf %11 : vector<64x128xf32> to vector<64x128xbf16>
    %37 = vector.shape_cast %36 : vector<64x128xbf16> to vector<4x16x128xbf16>
    %c0_21 = arith.constant 0 : index
    %c0_22 = arith.constant 0 : index
    %c0_23 = arith.constant 0 : index
    %38 = vector.load %arg7[%c0_21, %c0_22, %c0_23] : memref<4x16x128xbf16, #tpu.memory_space<vmem>>, vector<4x16x128xbf16>
    tpu.vector_store %arg7[%c0_21, %c0_22, %c0_23], %37 {strides = array<i32>} : memref<4x16x128xbf16, #tpu.memory_space<vmem>>, vector<4x16x128xbf16>,
    %39 = arith.extf %36 : vector<64x128xbf16> to vector<64x128xf32>
    %cst_24 = arith.constant dense<0.000000e+00> : vector<128xf32>
    %40 = vector.multi_reduction <add>, %39, %cst_24 [0] : vector<64x128xf32> to vector<128xf32>
    %41 = vector.shape_cast %40 : vector<128xf32> to vector<1x128xf32>
    %cst_25 = arith.constant 6.400000e+01 : f32
    %42 = vector.broadcast %cst_25 : f32 to vector<1x128xf32>
    %43 = arith.divf %41, %42 : vector<1x128xf32>
    %44 = vector.broadcast %43 : vector<1x128xf32> to vector<64x128xf32>
    %45 = arith.subf %39, %44 : vector<64x128xf32>
    %46 = arith.mulf %45, %45 : vector<64x128xf32>
    %cst_26 = arith.constant dense<0.000000e+00> : vector<128xf32>
    %47 = vector.multi_reduction <add>, %46, %cst_26 [0] : vector<64x128xf32> to vector<128xf32>
    %48 = vector.shape_cast %47 : vector<128xf32> to vector<1x128xf32>
    %49 = tpu.concatenate %41, %48 in 0 : vector<1x128xf32>, vector<1x128xf32> -> vector<2x128xf32>
    %50 = vector.shape_cast %49 : vector<2x128xf32> to vector<1x2x128xf32>
    %c0_27 = arith.constant 0 : index
    %c0_28 = arith.constant 0 : index
    %c0_29 = arith.constant 0 : index
    %51 = vector.load %arg8[%c0_27, %c0_28, %c0_29] : memref<1x2x128xf32, #tpu.memory_space<vmem>>, vector<1x2x128xf32>
    tpu.vector_store %arg8[%c0_27, %c0_28, %c0_29], %50 {strides = array<i32>} : memref<1x2x128xf32, #tpu.memory_space<vmem>>, vector<1x2x128xf32>,
    return
  }
  func.func @transform_0(%arg0: i32) -> (i32, i32, i32) {
    %c0_i32 = arith.constant 0 : i32
    %c0_i32_0 = arith.constant 0 : i32
    %c0_i32_1 = arith.constant 0 : i32
    return %arg0, %c0_i32, %c0_i32_0 : i32, i32, i32
  }
  func.func @transform_1(%arg0: i32) -> (i32, i32) {
    %c0_i32 = arith.constant 0 : i32
    %c0_i32_0 = arith.constant 0 : i32
    %c0_i32_1 = arith.constant 0 : i32
    return %c0_i32, %c0_i32_0 : i32, i32
  }
  func.func @transform_2(%arg0: i32) -> (i32, i32) {
    %c0_i32 = arith.constant 0 : i32
    %c0_i32_0 = arith.constant 0 : i32
    %c0_i32_1 = arith.constant 0 : i32
    return %c0_i32, %c0_i32_0 : i32, i32
  }
  func.func @transform_3(%arg0: i32) -> (i32, i32) {
    %c0_i32 = arith.constant 0 : i32
    %c0_i32_0 = arith.constant 0 : i32
    %c0_i32_1 = arith.constant 0 : i32
    return %c0_i32, %c0_i32_0 : i32, i32
  }
  func.func @transform_4(%arg0: i32) -> (i32, i32, i32) {
    %c0_i32 = arith.constant 0 : i32
    %c0_i32_0 = arith.constant 0 : i32
    %c0_i32_1 = arith.constant 0 : i32
    return %arg0, %c0_i32, %c0_i32_0 : i32, i32, i32
  }
  func.func @transform_5(%arg0: i32) -> (i32, i32, i32) {
    %c0_i32 = arith.constant 0 : i32
    %c0_i32_0 = arith.constant 0 : i32
    %c0_i32_1 = arith.constant 0 : i32
    return %arg0, %c0_i32, %c0_i32_0 : i32, i32, i32
  }
  func.func @transform_6(%arg0: i32) -> (i32, i32, i32) {
    %c0_i32 = arith.constant 0 : i32
    %c0_i32_0 = arith.constant 0 : i32
    %c0_i32_1 = arith.constant 0 : i32
    return %arg0, %c0_i32, %c0_i32_0 : i32, i32, i32
  }
  func.func @transform_7(%arg0: i32) -> (i32, i32, i32) {
    %c0_i32 = arith.constant 0 : i32
    %c0_i32_0 = arith.constant 0 : i32
    %c0_i32_1 = arith.constant 0 : i32
    return %arg0, %c0_i32, %c0_i32_0 : i32, i32, i32
  }
}

module attributes {stable_mosaic.version = 11 : i64} {
  func.func @_phase_c_kernel(%arg0: i32, %arg1: memref<4x16x128xbf16, #tpu.memory_space<vmem>>, %arg2: memref<4x16x128xbf16, #tpu.memory_space<vmem>>, %arg3: memref<1x128xf32, #tpu.memory_space<vmem>>, %arg4: memref<1x128xf32, #tpu.memory_space<vmem>>, %arg5: memref<1x128xf32, #tpu.memory_space<vmem>>, %arg6: memref<1x128xf32, #tpu.memory_space<vmem>>, %arg7: memref<4x16x128xbf16, #tpu.memory_space<vmem>>) attributes {dimension_semantics = [#tpu.dimension_semantics<parallel>], iteration_bounds = array<i64: 2>, scalar_prefetch = 0 : i64, scratch_operands = 0 : i64, tpu.core_type = #tpu.core_type<tc>, window_params = [{transform_indices = @transform_0, window_bounds = array<i64: 4, 16, 128>}, {transform_indices = @transform_1, window_bounds = array<i64: 4, 16, 128>}, {pipeline_mode = #tpu.pipeline_mode<synchronous>, transform_indices = @transform_2, window_bounds = array<i64: 1, 128>}, {pipeline_mode = #tpu.pipeline_mode<synchronous>, transform_indices = @transform_3, window_bounds = array<i64: 1, 128>}, {pipeline_mode = #tpu.pipeline_mode<synchronous>, transform_indices = @transform_4, window_bounds = array<i64: 1, 128>}, {pipeline_mode = #tpu.pipeline_mode<synchronous>, transform_indices = @transform_5, window_bounds = array<i64: 1, 128>}, {transform_indices = @transform_6, window_bounds = array<i64: 4, 16, 128>}]} {
    %c0 = arith.constant 0 : index
    %c0_0 = arith.constant 0 : index
    %c0_1 = arith.constant 0 : index
    %0 = vector.load %arg1[%c0, %c0_0, %c0_1] : memref<4x16x128xbf16, #tpu.memory_space<vmem>>, vector<4x16x128xbf16>
    %1 = arith.extf %0 : vector<4x16x128xbf16> to vector<4x16x128xf32>
    %c0_2 = arith.constant 0 : index
    %c0_3 = arith.constant 0 : index
    %2 = vector.load %arg3[%c0_2, %c0_3] : memref<1x128xf32, #tpu.memory_space<vmem>>, vector<1x128xf32>
    %3 = vector.shape_cast %2 : vector<1x128xf32> to vector<1x1x128xf32>
    %4 = vector.broadcast %3 : vector<1x1x128xf32> to vector<4x16x128xf32>
    %5 = arith.mulf %1, %4 : vector<4x16x128xf32>
    %c0_4 = arith.constant 0 : index
    %c0_5 = arith.constant 0 : index
    %6 = vector.load %arg4[%c0_4, %c0_5] : memref<1x128xf32, #tpu.memory_space<vmem>>, vector<1x128xf32>
    %7 = vector.shape_cast %6 : vector<1x128xf32> to vector<1x1x128xf32>
    %8 = vector.broadcast %7 : vector<1x1x128xf32> to vector<4x16x128xf32>
    %9 = arith.addf %5, %8 : vector<4x16x128xf32>
    %c0_6 = arith.constant 0 : index
    %c0_7 = arith.constant 0 : index
    %c0_8 = arith.constant 0 : index
    %10 = vector.load %arg2[%c0_6, %c0_7, %c0_8] : memref<4x16x128xbf16, #tpu.memory_space<vmem>>, vector<4x16x128xbf16>
    %11 = arith.extf %10 : vector<4x16x128xbf16> to vector<4x16x128xf32>
    %c0_9 = arith.constant 0 : index
    %c0_10 = arith.constant 0 : index
    %12 = vector.load %arg5[%c0_9, %c0_10] : memref<1x128xf32, #tpu.memory_space<vmem>>, vector<1x128xf32>
    %13 = vector.shape_cast %12 : vector<1x128xf32> to vector<1x1x128xf32>
    %14 = vector.broadcast %13 : vector<1x1x128xf32> to vector<4x16x128xf32>
    %15 = arith.mulf %11, %14 : vector<4x16x128xf32>
    %c0_11 = arith.constant 0 : index
    %c0_12 = arith.constant 0 : index
    %16 = vector.load %arg6[%c0_11, %c0_12] : memref<1x128xf32, #tpu.memory_space<vmem>>, vector<1x128xf32>
    %17 = vector.shape_cast %16 : vector<1x128xf32> to vector<1x1x128xf32>
    %18 = vector.broadcast %17 : vector<1x1x128xf32> to vector<4x16x128xf32>
    %19 = arith.addf %15, %18 : vector<4x16x128xf32>
    %20 = arith.addf %9, %19 : vector<4x16x128xf32>
    %cst = arith.constant 0.000000e+00 : f32
    %21 = vector.broadcast %cst : f32 to vector<4x16x128xf32>
    %22 = arith.maximumf %20, %21 : vector<4x16x128xf32>
    %23 = arith.truncf %22 : vector<4x16x128xf32> to vector<4x16x128xbf16>
    %c0_13 = arith.constant 0 : index
    %c0_14 = arith.constant 0 : index
    %c0_15 = arith.constant 0 : index
    %24 = vector.load %arg7[%c0_13, %c0_14, %c0_15] : memref<4x16x128xbf16, #tpu.memory_space<vmem>>, vector<4x16x128xbf16>
    tpu.vector_store %arg7[%c0_13, %c0_14, %c0_15], %23 {strides = array<i32>} : memref<4x16x128xbf16, #tpu.memory_space<vmem>>, vector<4x16x128xbf16>,
    return
  }
  func.func @transform_0(%arg0: i32) -> (i32, i32, i32) {
    %c0_i32 = arith.constant 0 : i32
    %c0_i32_0 = arith.constant 0 : i32
    %c0_i32_1 = arith.constant 0 : i32
    return %arg0, %c0_i32, %c0_i32_0 : i32, i32, i32
  }
  func.func @transform_1(%arg0: i32) -> (i32, i32, i32) {
    %c0_i32 = arith.constant 0 : i32
    %c0_i32_0 = arith.constant 0 : i32
    %c0_i32_1 = arith.constant 0 : i32
    return %arg0, %c0_i32, %c0_i32_0 : i32, i32, i32
  }
  func.func @transform_2(%arg0: i32) -> (i32, i32) {
    %c0_i32 = arith.constant 0 : i32
    %c0_i32_0 = arith.constant 0 : i32
    %c0_i32_1 = arith.constant 0 : i32
    return %c0_i32, %c0_i32_0 : i32, i32
  }
  func.func @transform_3(%arg0: i32) -> (i32, i32) {
    %c0_i32 = arith.constant 0 : i32
    %c0_i32_0 = arith.constant 0 : i32
    %c0_i32_1 = arith.constant 0 : i32
    return %c0_i32, %c0_i32_0 : i32, i32
  }
  func.func @transform_4(%arg0: i32) -> (i32, i32) {
    %c0_i32 = arith.constant 0 : i32
    %c0_i32_0 = arith.constant 0 : i32
    %c0_i32_1 = arith.constant 0 : i32
    return %c0_i32, %c0_i32_0 : i32, i32
  }
  func.func @transform_5(%arg0: i32) -> (i32, i32) {
    %c0_i32 = arith.constant 0 : i32
    %c0_i32_0 = arith.constant 0 : i32
    %c0_i32_1 = arith.constant 0 : i32
    return %c0_i32, %c0_i32_0 : i32, i32
  }
  func.func @transform_6(%arg0: i32) -> (i32, i32, i32) {
    %c0_i32 = arith.constant 0 : i32
    %c0_i32_0 = arith.constant 0 : i32
    %c0_i32_1 = arith.constant 0 : i32
    return %arg0, %c0_i32, %c0_i32_0 : i32, i32, i32
  }
}

module attributes {stable_mosaic.version = 11 : i64} {
  func.func @_phase_b_kernel(%arg0: i32, %arg1: memref<4x16x128xbf16, #tpu.memory_space<vmem>>, %arg2: memref<128x128xbf16, #tpu.memory_space<vmem>>, %arg3: memref<128x128xbf16, #tpu.memory_space<vmem>>, %arg4: memref<128x128xbf16, #tpu.memory_space<vmem>>, %arg5: memref<1x128xf32, #tpu.memory_space<vmem>>, %arg6: memref<1x128xf32, #tpu.memory_space<vmem>>, %arg7: memref<4x16x128xbf16, #tpu.memory_space<vmem>>, %arg8: memref<1x2x128xf32, #tpu.memory_space<vmem>>) attributes {dimension_semantics = [#tpu.dimension_semantics<parallel>], iteration_bounds = array<i64: 2>, scalar_prefetch = 0 : i64, scratch_operands = 0 : i64, tpu.core_type = #tpu.core_type<tc>, window_params = [{transform_indices = @transform_0, window_bounds = array<i64: 4, 16, 128>}, {pipeline_mode = #tpu.pipeline_mode<synchronous>, transform_indices = @transform_1, window_bounds = array<i64: 128, 128>}, {pipeline_mode = #tpu.pipeline_mode<synchronous>, transform_indices = @transform_2, window_bounds = array<i64: 128, 128>}, {pipeline_mode = #tpu.pipeline_mode<synchronous>, transform_indices = @transform_3, window_bounds = array<i64: 128, 128>}, {pipeline_mode = #tpu.pipeline_mode<synchronous>, transform_indices = @transform_4, window_bounds = array<i64: 1, 128>}, {pipeline_mode = #tpu.pipeline_mode<synchronous>, transform_indices = @transform_5, window_bounds = array<i64: 1, 128>}, {transform_indices = @transform_6, window_bounds = array<i64: 4, 16, 128>}, {transform_indices = @transform_7, window_bounds = array<i64: 1, 2, 128>}]} {
    %c0 = arith.constant 0 : index
    %c0_0 = arith.constant 0 : index
    %c0_1 = arith.constant 0 : index
    %0 = vector.load %arg1[%c0, %c0_0, %c0_1] : memref<4x16x128xbf16, #tpu.memory_space<vmem>>, vector<4x16x128xbf16>
    %1 = arith.extf %0 : vector<4x16x128xbf16> to vector<4x16x128xf32>
    %c0_2 = arith.constant 0 : index
    %c0_3 = arith.constant 0 : index
    %2 = vector.load %arg5[%c0_2, %c0_3] : memref<1x128xf32, #tpu.memory_space<vmem>>, vector<1x128xf32>
    %3 = vector.shape_cast %2 : vector<1x128xf32> to vector<1x1x128xf32>
    %4 = vector.broadcast %3 : vector<1x1x128xf32> to vector<4x16x128xf32>
    %5 = arith.mulf %1, %4 : vector<4x16x128xf32>
    %c0_4 = arith.constant 0 : index
    %c0_5 = arith.constant 0 : index
    %6 = vector.load %arg6[%c0_4, %c0_5] : memref<1x128xf32, #tpu.memory_space<vmem>>, vector<1x128xf32>
    %7 = vector.shape_cast %6 : vector<1x128xf32> to vector<1x1x128xf32>
    %8 = vector.broadcast %7 : vector<1x1x128xf32> to vector<4x16x128xf32>
    %9 = arith.addf %5, %8 : vector<4x16x128xf32>
    %cst = arith.constant 0.000000e+00 : f32
    %10 = vector.broadcast %cst : f32 to vector<4x16x128xf32>
    %11 = arith.maximumf %9, %10 : vector<4x16x128xf32>
    %12 = arith.truncf %11 : vector<4x16x128xf32> to vector<4x16x128xbf16>
    %cst_6 = arith.constant 0.000000e+00 : bf16
    %13 = vector.broadcast %cst_6 : bf16 to vector<4x1x128xbf16>
    %14 = vector.extract_strided_slice %12 {offsets = [0, 0, 0], sizes = [4, 15, 128], strides = [1, 1, 1]} : vector<4x16x128xbf16> to vector<4x15x128xbf16>
    %15 = tpu.concatenate %13, %14 in 1 : vector<4x1x128xbf16>, vector<4x15x128xbf16> -> vector<4x16x128xbf16>
    %cst_7 = arith.constant 0.000000e+00 : bf16
    %16 = vector.broadcast %cst_7 : bf16 to vector<4x1x128xbf16>
    %17 = vector.extract_strided_slice %12 {offsets = [0, 1, 0], sizes = [4, 15, 128], strides = [1, 1, 1]} : vector<4x16x128xbf16> to vector<4x15x128xbf16>
    %18 = tpu.concatenate %17, %16 in 1 : vector<4x15x128xbf16>, vector<4x1x128xbf16> -> vector<4x16x128xbf16>
    %19 = vector.shape_cast %12 : vector<4x16x128xbf16> to vector<64x128xbf16>
    %c0_8 = arith.constant 0 : index
    %c0_9 = arith.constant 0 : index
    %20 = vector.load %arg3[%c0_8, %c0_9] : memref<128x128xbf16, #tpu.memory_space<vmem>>, vector<128x128xbf16>
    %cst_10 = arith.constant dense<0.000000e+00> : vector<64x128xf32>
    %21 = tpu.matmul %19, %20, %cst_10 {dimension_numbers = #tpu.dot_dimension_numbers<[1], [0], [0], [1], [0, 0, 1, 1], [], []>} : vector<64x128xbf16>, vector<128x128xbf16>, vector<64x128xf32> -> vector<64x128xf32>
    %22 = vector.shape_cast %15 : vector<4x16x128xbf16> to vector<64x128xbf16>
    %c0_11 = arith.constant 0 : index
    %c0_12 = arith.constant 0 : index
    %23 = vector.load %arg2[%c0_11, %c0_12] : memref<128x128xbf16, #tpu.memory_space<vmem>>, vector<128x128xbf16>
    %cst_13 = arith.constant dense<0.000000e+00> : vector<64x128xf32>
    %24 = tpu.matmul %22, %23, %cst_13 {dimension_numbers = #tpu.dot_dimension_numbers<[1], [0], [0], [1], [0, 0, 1, 1], [], []>} : vector<64x128xbf16>, vector<128x128xbf16>, vector<64x128xf32> -> vector<64x128xf32>
    %25 = arith.addf %21, %24 : vector<64x128xf32>
    %26 = vector.shape_cast %18 : vector<4x16x128xbf16> to vector<64x128xbf16>
    %c0_14 = arith.constant 0 : index
    %c0_15 = arith.constant 0 : index
    %27 = vector.load %arg4[%c0_14, %c0_15] : memref<128x128xbf16, #tpu.memory_space<vmem>>, vector<128x128xbf16>
    %cst_16 = arith.constant dense<0.000000e+00> : vector<64x128xf32>
    %28 = tpu.matmul %26, %27, %cst_16 {dimension_numbers = #tpu.dot_dimension_numbers<[1], [0], [0], [1], [0, 0, 1, 1], [], []>} : vector<64x128xbf16>, vector<128x128xbf16>, vector<64x128xf32> -> vector<64x128xf32>
    %29 = arith.addf %25, %28 : vector<64x128xf32>
    %30 = arith.truncf %29 : vector<64x128xf32> to vector<64x128xbf16>
    %31 = vector.shape_cast %30 : vector<64x128xbf16> to vector<4x16x128xbf16>
    %c0_17 = arith.constant 0 : index
    %c0_18 = arith.constant 0 : index
    %c0_19 = arith.constant 0 : index
    %32 = vector.load %arg7[%c0_17, %c0_18, %c0_19] : memref<4x16x128xbf16, #tpu.memory_space<vmem>>, vector<4x16x128xbf16>
    tpu.vector_store %arg7[%c0_17, %c0_18, %c0_19], %31 {strides = array<i32>} : memref<4x16x128xbf16, #tpu.memory_space<vmem>>, vector<4x16x128xbf16>,
    %33 = arith.extf %30 : vector<64x128xbf16> to vector<64x128xf32>
    %cst_20 = arith.constant dense<0.000000e+00> : vector<128xf32>
    %34 = vector.multi_reduction <add>, %33, %cst_20 [0] : vector<64x128xf32> to vector<128xf32>
    %35 = vector.shape_cast %34 : vector<128xf32> to vector<1x128xf32>
    %cst_21 = arith.constant 6.400000e+01 : f32
    %36 = vector.broadcast %cst_21 : f32 to vector<1x128xf32>
    %37 = arith.divf %35, %36 : vector<1x128xf32>
    %38 = vector.broadcast %37 : vector<1x128xf32> to vector<64x128xf32>
    %39 = arith.subf %33, %38 : vector<64x128xf32>
    %40 = arith.mulf %39, %39 : vector<64x128xf32>
    %cst_22 = arith.constant dense<0.000000e+00> : vector<128xf32>
    %41 = vector.multi_reduction <add>, %40, %cst_22 [0] : vector<64x128xf32> to vector<128xf32>
    %42 = vector.shape_cast %41 : vector<128xf32> to vector<1x128xf32>
    %43 = tpu.concatenate %35, %42 in 0 : vector<1x128xf32>, vector<1x128xf32> -> vector<2x128xf32>
    %44 = vector.shape_cast %43 : vector<2x128xf32> to vector<1x2x128xf32>
    %c0_23 = arith.constant 0 : index
    %c0_24 = arith.constant 0 : index
    %c0_25 = arith.constant 0 : index
    %45 = vector.load %arg8[%c0_23, %c0_24, %c0_25] : memref<1x2x128xf32, #tpu.memory_space<vmem>>, vector<1x2x128xf32>
    tpu.vector_store %arg8[%c0_23, %c0_24, %c0_25], %44 {strides = array<i32>} : memref<1x2x128xf32, #tpu.memory_space<vmem>>, vector<1x2x128xf32>,
    return
  }
  func.func @transform_0(%arg0: i32) -> (i32, i32, i32) {
    %c0_i32 = arith.constant 0 : i32
    %c0_i32_0 = arith.constant 0 : i32
    %c0_i32_1 = arith.constant 0 : i32
    return %arg0, %c0_i32, %c0_i32_0 : i32, i32, i32
  }
  func.func @transform_1(%arg0: i32) -> (i32, i32) {
    %c0_i32 = arith.constant 0 : i32
    %c0_i32_0 = arith.constant 0 : i32
    %c0_i32_1 = arith.constant 0 : i32
    return %c0_i32, %c0_i32_0 : i32, i32
  }
  func.func @transform_2(%arg0: i32) -> (i32, i32) {
    %c0_i32 = arith.constant 0 : i32
    %c0_i32_0 = arith.constant 0 : i32
    %c0_i32_1 = arith.constant 0 : i32
    return %c0_i32, %c0_i32_0 : i32, i32
  }
  func.func @transform_3(%arg0: i32) -> (i32, i32) {
    %c0_i32 = arith.constant 0 : i32
    %c0_i32_0 = arith.constant 0 : i32
    %c0_i32_1 = arith.constant 0 : i32
    return %c0_i32, %c0_i32_0 : i32, i32
  }
  func.func @transform_4(%arg0: i32) -> (i32, i32) {
    %c0_i32 = arith.constant 0 : i32
    %c0_i32_0 = arith.constant 0 : i32
    %c0_i32_1 = arith.constant 0 : i32
    return %c0_i32, %c0_i32_0 : i32, i32
  }
  func.func @transform_5(%arg0: i32) -> (i32, i32) {
    %c0_i32 = arith.constant 0 : i32
    %c0_i32_0 = arith.constant 0 : i32
    %c0_i32_1 = arith.constant 0 : i32
    return %c0_i32, %c0_i32_0 : i32, i32
  }
  func.func @transform_6(%arg0: i32) -> (i32, i32, i32) {
    %c0_i32 = arith.constant 0 : i32
    %c0_i32_0 = arith.constant 0 : i32
    %c0_i32_1 = arith.constant 0 : i32
    return %arg0, %c0_i32, %c0_i32_0 : i32, i32, i32
  }
  func.func @transform_7(%arg0: i32) -> (i32, i32, i32) {
    %c0_i32 = arith.constant 0 : i32
    %c0_i32_0 = arith.constant 0 : i32
    %c0_i32_1 = arith.constant 0 : i32
    return %arg0, %c0_i32, %c0_i32_0 : i32, i32, i32
  }
}

</mosaic_0001>

<bundles_post_ra>
// kernel: basic_block_1d.5
= control target key start
LH: loop header
LB: loop body
LE: loop exit
PB: predicated region body
PF: predicated region fallthrough
CT: control target
= control target key end

     0   :  { %s654_s21 = smov 0   ;;  %s703_s0 = inlined_call_operand.vmem [shape: bf16[8,16,128], index: 0, kind: input, shape index: {}, may-alias: {0,6}]   ;;  %s704_s1 = inlined_call_operand.vmem [shape: bf16[8,16,128], index: 1, kind: input, shape index: {}]   ;;  %s705_s2 = inlined_call_operand.vmem [shape: f32[1,128], index: 2, kind: input, shape index: {}]   ;;  %s706_s3 = inlined_call_operand.vmem [shape: f32[1,128], index: 3, kind: input, shape index: {}]   ;;  %s707_s4 = inlined_call_operand.vmem [shape: f32[1,128], index: 4, kind: input, shape index: {}]   ;;  %s708_s5 = inlined_call_operand.vmem [shape: f32[1,128], index: 5, kind: input, shape index: {}]   ;;  %s709_s6 = inlined_call_operand.vmem [shape: bf16[8,16,128], index: 6, kind: output, shape index: {}, may-alias: {0,6}]  }
   0x1 LB: > { %s503_s22 = sadd.s32 4294967295, %s617_s21   ;;  %p507_p0 = scmp.ge.s32.totalorder %s617_s21, 1  ;;  %s617_s21 = sphi %s654_s21, %s16_s21  }
   0x2   : > { %p226_p1 = scmp.lt.s32.totalorder %s617_s21, 3 }
   0x4   : > { %p227_p2 = pnand %p507_p0, %p226_p1 }
   0x5   : > { %s508_s23 = sshll.u32 (!%p227_p2), %s503_s22, 2 }
   0x6   : > { %230 = sbr.rel (%p227_p2) target bundleno = 40 (0x28), region = 44  ;;  %p265_p3 = scmp.lt.s32.totalorder (!%p227_p2), %s508_s23, 7 }
   0xb   : > { %s711_s23 = smov (!%p265_p3, %s508_s23), 7  ;;  %v517_v0 = vld [vmem:[%s705_s2] ss:$0 sm:$0xff] }
   0xc   : > { %s662_s24 = sshll.u32 %s711_s23, 3  ;;  %v518_v12 = vld [vmem:[%s706_s3] ss:$0 sm:$0xff] }
   0xd   : > { %s668_s27 = scalar_lea.vmem %s703_s0, %s662_s24  ;;  %s674_s30 = scalar_lea.vmem %s704_s1, %s662_s24  ;;  %v519_v20 = vld [vmem:[%s707_s4] ss:$0 sm:$0xff] }
   0xe   : > { %v543_v1 = vld [vmem:[%s668_s27] sm:$0xff]   ;;  %v594_v2 = vld [vmem:[%s668_s27 + $0x8] sm:$0xff]   ;;  %v595_v3 = vld [vmem:[%s668_s27 + $0x10] sm:$0xff]   ;;  %s283_s17 = scalar_lea.vmem %s709_s6, %s662_s24 }
   0xf   : > { %v544_v4 = vunpack.c.l.bf16 %v543_v1  ;;  %v545_v5 = vunpack.c.h.bf16 %v543_v1  ;;  %v548_v6 = vunpack.c.l.bf16 %v594_v2  ;;  %v549_v7 = vunpack.c.h.bf16 %v594_v2  ;;  %v559_v8 = vld [vmem:[%s674_s30] sm:$0xff]   ;;  %v597_v9 = vld [vmem:[%s674_s30 + $0x8] sm:$0xff]   ;;  %v598_v19 = vld [vmem:[%s674_s30 + $0x10] sm:$0xff]  }
  0x10   : > { %v552_v10 = vunpack.c.l.bf16 %v595_v3  ;;  %v553_v11 = vunpack.c.h.bf16 %v595_v3  ;;  %v560_v13 = vunpack.c.l.bf16 %v559_v8  ;;  %v561_v14 = vunpack.c.h.bf16 %v559_v8  ;;  %v520_v29 = vld [vmem:[%s708_s5] ss:$0 sm:$0xff]  ;;  %v596_v30 = vld [vmem:[%s668_s27 + $0x18] sm:$0xff]  }
  0x11   : > { %v308_v15 = vmul.f32 %v544_v4, %v517_v0  ;;  %v309_v16 = vmul.f32 %v545_v5, %v517_v0  ;;  %v310_v17 = vmul.f32 %v548_v6, %v517_v0  ;;  %v311_v18 = vmul.f32 %v549_v7, %v517_v0  ;;  %v599_v54 = vld [vmem:[%s674_s30 + $0x18] sm:$0xff]  }
  0x12   : > { %v312_v21 = vmul.f32 %v552_v10, %v517_v0  ;;  %v313_v22 = vmul.f32 %v553_v11, %v517_v0  ;;  %v564_v23 = vunpack.c.l.bf16 %v597_v9  ;;  %v565_v24 = vunpack.c.h.bf16 %v597_v9 }
  0x13   : > { %v323_v25 = vadd.f32 %v518_v12, %v308_v15  ;;  %v324_v26 = vadd.f32 %v518_v12, %v309_v16  ;;  %v325_v27 = vadd.f32 %v518_v12, %v310_v17  ;;  %v326_v28 = vadd.f32 %v518_v12, %v311_v18 }
  0x14   : > { %v568_v31 = vunpack.c.l.bf16 %v598_v19  ;;  %v569_v32 = vunpack.c.h.bf16 %v598_v19  ;;  %v354_v33 = vmul.f32 %v560_v13, %v519_v20  ;;  %v355_v34 = vmul.f32 %v561_v14, %v519_v20 }
  0x15   : > { %v356_v35 = vmul.f32 %v564_v23, %v519_v20  ;;  %v357_v36 = vmul.f32 %v565_v24, %v519_v20  ;;  %v327_v37 = vadd.f32 %v518_v12, %v312_v21  ;;  %v328_v38 = vadd.f32 %v518_v12, %v313_v22 }
  0x16   : > { %v369_v39 = vadd.f32 %v520_v29, %v354_v33  ;;  %v370_v40 = vadd.f32 %v520_v29, %v355_v34  ;;  %v358_v41 = vmul.f32 %v568_v31, %v519_v20  ;;  %v359_v42 = vmul.f32 %v569_v32, %v519_v20 }
  0x17   : > { %v371_v43 = vadd.f32 %v520_v29, %v356_v35  ;;  %v372_v44 = vadd.f32 %v520_v29, %v357_v36  ;;  %v556_v45 = vunpack.c.l.bf16 %v596_v30  ;;  %v557_v46 = vunpack.c.h.bf16 %v596_v30 }
  0x18   : > { %v377_v47 = vadd.f32 %v369_v39, %v323_v25  ;;  %v378_v48 = vadd.f32 %v370_v40, %v324_v26  ;;  %v373_v49 = vadd.f32 %v520_v29, %v358_v41  ;;  %v374_v50 = vadd.f32 %v520_v29, %v359_v42 }
  0x19   : > { %v379_v51 = vadd.f32 %v371_v43, %v325_v27  ;;  %v380_v52 = vadd.f32 %v372_v44, %v326_v28  ;;  %v314_v53 = vmul.f32 %v556_v45, %v517_v0  ;;  %v315_v61 = vmul.f32 %v557_v46, %v517_v0 }
  0x1a   : > { %v385_v55 = vmax.f32 %v377_v47, 0.0  ;;  %v386_v56 = vmax.f32 %v378_v48, 0.0  ;;  %v381_v57 = vadd.f32 %v373_v49, %v327_v37  ;;  %v382_v58 = vadd.f32 %v374_v50, %v328_v38 }
  0x1b   : > { %v387_v59 = vmax.f32 %v379_v51, 0.0  ;;  %v388_v60 = vmax.f32 %v380_v52, 0.0  ;;  %v572_v2 = vunpack.c.l.bf16 %v599_v54  ;;  %v573_v4 = vunpack.c.h.bf16 %v599_v54 }
  0x1c   : > { %v577_v62 = vpack.c.bf16 %v386_v56, %v385_v55  ;;  %v389_v63 = vmax.f32 %v381_v57, 0.0  ;;  %v390_v1 = vmax.f32 %v382_v58, 0.0  ;;  %v329_v6 = vadd.f32 %v518_v12, %v314_v53 }
  0x1d   : > { %v582_v3 = vpack.c.bf16 %v388_v60, %v387_v59  ;;  %v360_v7 = vmul.f32 %v572_v2, %v519_v20  ;;  %v330_v8 = vadd.f32 %v518_v12, %v315_v61  ;;  %v361_v9 = vmul.f32 %v573_v4, %v519_v20 }
  0x1e   : > { %578 = vst [vmem:[%s283_s17] sm:$0xff] %v577_v62   ;;  %v587_v5 = vpack.c.bf16 %v390_v1, %v389_v63 }
  0x1f   : > { %600 = vst [vmem:[%s283_s17 + $0x8] sm:$0xff] %v582_v3   ;;  %v375_v10 = vadd.f32 %v520_v29, %v360_v7  ;;  %v376_v11 = vadd.f32 %v520_v29, %v361_v9 }
  0x20   : > { %601 = vst [vmem:[%s283_s17 + $0x10] sm:$0xff] %v587_v5  }
  0x21   : > { %v383_v13 = vadd.f32 %v375_v10, %v329_v6  ;;  %v384_v14 = vadd.f32 %v376_v11, %v330_v8 }
  0x23   : > { %v391_v15 = vmax.f32 %v383_v13, 0.0  ;;  %v392_v0 = vmax.f32 %v384_v14, 0.0 }
  0x25   : > { %v592_v16 = vpack.c.bf16 %v392_v0, %v391_v15 }
  0x27   : > { %602 = vst [vmem:[%s283_s17 + $0x18] sm:$0xff] %v592_v16  }
  0x28 PF: > { %s16_s21 = sadd.s32 1, %s617_s21  }
  0x29   : > { %p13_p4 = scmp.ge.s32.totalorder %s16_s21, 4  }
  0x2b   :  { %15 = sbr.rel (!%p13_p4) target bundleno = 1 (0x1), region = 77 }

// kernel: basic_block_1d.4
= control target key start
LH: loop header
LB: loop body
LE: loop exit
PB: predicated region body
PF: predicated region fallthrough
CT: control target
= control target key end

     0   :  { %s1298_s24 = smov 0   ;;  %s1464_s0 = inlined_call_operand.vmem [shape: bf16[8,16,128], index: 0, kind: input, shape index: {}]   ;;  %s1465_s1 = inlined_call_operand.vmem [shape: bf16[128,128], index: 1, kind: input, shape index: {}]   ;;  %s1466_s2 = inlined_call_operand.vmem [shape: bf16[128,128], index: 2, kind: input, shape index: {}]   ;;  %s1467_s3 = inlined_call_operand.vmem [shape: bf16[128,128], index: 3, kind: input, shape index: {}]   ;;  %s1468_s4 = inlined_call_operand.vmem [shape: f32[1,128], index: 4, kind: input, shape index: {}]   ;;  %s1469_s5 = inlined_call_operand.vmem [shape: f32[1,128], index: 5, kind: input, shape index: {}]   ;;  %s1470_s6 = inlined_call_operand.vmem [shape: bf16[8,16,128], index: 6, kind: output, shape index: {0}]   ;;  %s1471_s7 = inlined_call_operand.vmem [shape: f32[2,2,128], index: 7, kind: output, shape index: {1}]  }
   0x1 LB: > { %s1304_s25 = sadd.s32 4294967295, %s1256_s24   ;;  %p998_p0 = scmp.ge.s32.totalorder %s1256_s24, 1  ;;  %s1256_s24 = sphi %s1298_s24, %s18_s24  }
   0x2   : > { %p242_p1 = scmp.lt.s32.totalorder %s1256_s24, 3 }
   0x4   : > { %p243_p2 = pnand %p998_p0, %p242_p1 }
   0x5   : > { %s999_s28 = sshll.u32 (!%p243_p2), %s1304_s25, 2  ;;  %p294_p4 = scmp.lt.s32.totalorder (!%p243_p2), %s1304_s25, 1 }
   0x6   : > { %246 = sbr.rel (%p243_p2) target bundleno = 341 (0x155), region = 44  ;;  %p281_p3 = scmp.lt.s32.totalorder (!%p243_p2), %s999_s28, 7 }
   0xb   : > { %v1226_v0 = vld [vmem:[%s1465_s1 + $0x38] sm:$0xff]   ;;  %v1228_v2 = vld [vmem:[%s1465_s1 + $0x30] sm:$0xff]   ;;  %v1230_v4 = vld [vmem:[%s1465_s1 + $0x28] sm:$0xff]   ;;  %s1477_s28 = smov (!%p281_p3, %s999_s28), 7  ;;  %vm389_vm0 = vcmask 1040384   ;;  %vm408_vm3 = vcmask 1047552  }
   0xc   : > { %v1227_v1 = vld [vmem:[%s1466_s2 + $0x38] sm:$0xff]   ;;  %1130 = vmatprep.subr.bf16.mxu0 %v1226_v0  ;;  %v1229_v3 = vld [vmem:[%s1466_s2 + $0x30] sm:$0xff]   ;;  %v1231_v5 = vld [vmem:[%s1466_s2 + $0x28] sm:$0xff]   ;;  %s1042_s20 = sshll.u32 %s1477_s28, 3  ;;  %vm390_vm1 = vsmask.f32 256 }
   0xd   : > { %1154 = vmatprep.subr.bf16.mxu1 %v1227_v1  ;;  %1131 = vmatpush3.bf16.msra.mxu0 %v1226_v0  ;;  %v1232_v6 = vld [vmem:[%s1465_s1 + $0x20] sm:$0xff]   ;;  %v1234_v8 = vld [vmem:[%s1465_s1 + $0x18] sm:$0xff]   ;;  %s1347_s30 = scalar_lea.vmem %s1464_s0, %s1042_s20  ;;  %v1236_v10 = vld [vmem:[%s1465_s1 + $0x10] sm:$0xff]   ;;  %vm409_vm4 = vsmask.f32 7424  ;;  %s292_s26 = scalar_lea.vmem %s1470_s6, %s1042_s20 }
   0xe   : > { %1155 = vmatpush3.bf16.msra.mxu1 %v1227_v1  ;;  %1132 = vmatprep.subr.bf16.mxu0 %v1228_v2  ;;  %v1233_v7 = vld [vmem:[%s1466_s2 + $0x20] sm:$0xff]   ;;  %v1235_v9 = vld [vmem:[%s1466_s2 + $0x18] sm:$0xff]   ;;  %v1237_v13 = vld [vmem:[%s1466_s2 + $0x10] sm:$0xff]   ;;  %s1479_s25 = smov (!%p294_p4, %s1304_s25), 1 }
   0xf   : > { %1156 = vmatprep.subr.bf16.mxu1 %v1229_v3  ;;  %v1053_v11 = vld [vmem:[%s1347_s30] sm:$0xff]   ;;  %v1088_v16 = vld [vmem:[%s1347_s30 + $0x8] sm:$0xff]   ;;  %v1089_v30 = vld [vmem:[%s1347_s30 + $0x10] sm:$0xff]   ;;  %s1005_s28 = sshll.u32 %s1479_s25, 1 }
  0x10   : > { %v1006_v12 = vld [vmem:[%s1468_s4] ss:$0 sm:$0xff]  ;;  %v1054_v14 = vunpack.c.l.bf16 %v1053_v11  ;;  %v1055_v15 = vunpack.c.h.bf16 %v1053_v11  ;;  %v1058_v18 = vunpack.c.l.bf16 %v1088_v16  ;;  %v1059_v19 = vunpack.c.h.bf16 %v1088_v16  ;;  %v1238_v22 = vld [vmem:[%s1465_s1 + $0x8] sm:$0xff]   ;;  %v1090_v36 = vld [vmem:[%s1347_s30 + $0x18] sm:$0xff]   ;;  %s297_s29 = scalar_lea.vmem %s1471_s7, %s1005_s28 }
  0x11   : > { %1133 = vmatpush3.bf16.msra.mxu0 %v1228_v2  ;;  %v1007_v17 = vld [vmem:[%s1469_s5] ss:$0 sm:$0xff]  ;;  %v1239_v25 = vld [vmem:[%s1466_s2 + $0x8] sm:$0xff]   ;;  %v1062_v34 = vunpack.c.l.bf16 %v1089_v30  ;;  %v1063_v35 = vunpack.c.h.bf16 %v1089_v30  ;;  %v1066_v39 = vunpack.c.l.bf16 %v1090_v36  ;;  %v1067_v40 = vunpack.c.h.bf16 %v1090_v36  ;;  %v1242_v54 = vld [vmem:[%s1467_s3 + $0x38] sm:$0xff]  }
  0x12   : > { %1157 = vmatpush3.bf16.msra.mxu1 %v1229_v3  ;;  %1134 = vmatprep.subr.bf16.mxu0 %v1230_v4  ;;  %v322_v20 = vmul.f32 %v1054_v14, %v1006_v12  ;;  %v323_v21 = vmul.f32 %v1055_v15, %v1006_v12  ;;  %v324_v23 = vmul.f32 %v1058_v18, %v1006_v12  ;;  %v1240_v31 = vld [vmem:[%s1465_s1] sm:$0xff]   ;;  %vm1391_vm2 = vmand %vm389_vm0, %vm390_vm1  ;;  %v1244_v15 = vld [vmem:[%s1467_s3 + $0x28] sm:$0xff]  }
  0x13   : > { %1158 = vmatprep.subr.bf16.mxu1 %v1231_v5  ;;  %v325_v24 = vmul.f32 %v1059_v19, %v1006_v12  ;;  %v1241_v41 = vld [vmem:[%s1466_s2] sm:$0xff]   ;;  %v326_v43 = vmul.f32 %v1062_v34, %v1006_v12  ;;  %v327_v44 = vmul.f32 %v1063_v35, %v1006_v12  ;;  %v328_v46 = vmul.f32 %v1066_v39, %v1006_v12  ;;  %vm1418_vm5 = vmand %vm408_vm3, %vm409_vm4 }
  0x14   : > { %v337_v26 = vadd.f32 %v1007_v17, %v322_v20  ;;  %v338_v27 = vadd.f32 %v1007_v17, %v323_v21  ;;  %v339_v28 = vadd.f32 %v1007_v17, %v324_v23  ;;  %v329_v47 = vmul.f32 %v1067_v40, %v1006_v12  ;;  %v1245_v23 = vld [vmem:[%s1467_s3 + $0x20] sm:$0xff]  }
  0x15   : > { %1135 = vmatpush3.bf16.msra.mxu0 %v1230_v4  ;;  %v340_v29 = vadd.f32 %v1007_v17, %v325_v24  ;;  %v341_v50 = vadd.f32 %v1007_v17, %v326_v43  ;;  %v342_v51 = vadd.f32 %v1007_v17, %v327_v44  ;;  %v343_v55 = vadd.f32 %v1007_v17, %v328_v46 }
  0x16   : > { %1159 = vmatpush3.bf16.msra.mxu1 %v1231_v5  ;;  %1136 = vmatprep.subr.bf16.mxu0 %v1232_v6  ;;  %v345_v32 = vmax.f32 %v337_v26, 0.0  ;;  %v346_v33 = vmax.f32 %v338_v27, 0.0  ;;  %v347_v37 = vmax.f32 %v339_v28, 0.0  ;;  %v344_v56 = vadd.f32 %v1007_v17, %v329_v47  ;;  %v1243_v5 = vld [vmem:[%s1467_s3 + $0x30] sm:$0xff]   ;;  %v1246_v26 = vld [vmem:[%s1467_s3 + $0x18] sm:$0xff]   ;;  %v1248_v28 = vld [vmem:[%s1467_s3 + $0x8] sm:$0xff]  }
  0x17   : > { %1160 = vmatprep.subr.bf16.mxu1 %v1233_v7  ;;  %v348_v38 = vmax.f32 %v340_v29, 0.0  ;;  %v349_v58 = vmax.f32 %v341_v50, 0.0  ;;  %v350_v59 = vmax.f32 %v342_v51, 0.0  ;;  %v351_v62 = vmax.f32 %v343_v55, 0.0  ;;  %v1247_v27 = vld [vmem:[%s1467_s3 + $0x10] sm:$0xff]  }
  0x18   : > { %v1377_v42 = vpack.c.bf16 %v346_v33, %v345_v32  ;;  %v352_v63 = vmax.f32 %v344_v56, 0.0 }
  0x19   : > { %1137 = vmatpush3.bf16.msra.mxu0 %v1232_v6  ;;  %v1379_v45 = vpack.c.bf16 %v348_v38, %v347_v37  ;;  %v355_v1 = vpack.c.bf16 %v350_v59, %v349_v58 }
  0x1a   : > { %1161 = vmatpush3.bf16.msra.mxu1 %v1233_v7  ;;  %1138 = vmatprep.subr.bf16.mxu0 %v1234_v8  ;;  %v358_v48 = vshrl.u32 %v1377_v42, 16  ;;  %v361_v49 = vshll.u32 %v1377_v42, 16  ;;  %v1399_v3 = vpack.c.bf16 %v352_v63, %v351_v62 }
  0x1b   : > { %1162 = vmatprep.subr.bf16.mxu1 %v1235_v9  ;;  %1170 = vmatprep.mubr.bf16.mxu1 %v1377_v42  ;;  %v365_v52 = vshrl.u32 %v1379_v45, 16  ;;  %v368_v53 = vshll.u32 %v1379_v45, 16  ;;  %v372_v6 = vshrl.u32 %v355_v1, 16  ;;  %v375_v7 = vshll.u32 %v355_v1, 16 }
  0x1c   : > { %v360_v57 = vrot.slane %v358_v48, 7  ;;  %v396_v12 = vrot.slane %v361_v49, 1 }
  0x1d   : > { %1139 = vmatpush3.bf16.msra.mxu0 %v1234_v8  ;;  %v367_v61 = vrot.slane %v365_v52, 7  ;;  %v374_v11 = vrot.slane %v372_v6, 7  ;;  %v398_v29 = vrot.slane %v368_v53, 1 }
  0x1e   : > { %1163 = vmatpush3.bf16.msra.mxu1 %v1235_v9  ;;  %1140 = vmatprep.subr.bf16.mxu0 %v1236_v10  ;;  %v363_v0 = vor.u32 %v361_v49, %v360_v57  ;;  %v379_v9 = vshrl.u32 %v1399_v3, 16  ;;  %v397_v19 = vor.u32 %v396_v12, %v358_v48 }
  0x1f   : > { %1164 = vmatprep.subr.bf16.mxu1 %v1237_v13  ;;  %v370_v2 = vor.u32 %v368_v53, %v367_v61  ;;  %v377_v16 = vor.u32 %v375_v7, %v374_v11  ;;  %v399_v32 = vor.u32 %v398_v29, %v365_v52 }
  0x20   : > { %v392_v4 = vsel %vm1391_vm2, 0, %v363_v0  ;;  %v381_v14 = vrot.slane %v379_v9, 7  ;;  %v411_v24 = vsel %vm1418_vm5, %v397_v19, 0 }
  0x21   : > { %1141 = vmatpush3.bf16.msra.mxu0 %v1236_v10  ;;  %1146 = vmatprep.mubr.bf16.mxu0 %v392_v4  ;;  %v393_v8 = vsel %vm1391_vm2, 0, %v370_v2  ;;  %v382_v10 = vshll.u32 %v1399_v3, 16  ;;  %v394_v18 = vsel %vm1391_vm2, 0, %v377_v16  ;;  %v412_v34 = vsel %vm1418_vm5, %v399_v32, 0 }
  0x22   : > { %1165 = vmatpush3.bf16.msra.mxu1 %v1237_v13  ;;  %1142 = vmatprep.subr.bf16.mxu0 %v1238_v22  ;;  %v400_v13 = vrot.slane %v375_v7, 1 }
  0x23   : > { %1166 = vmatprep.subr.bf16.mxu1 %v1239_v25  ;;  %v384_v17 = vor.u32 %v382_v10, %v381_v14  ;;  %v402_v30 = vrot.slane %v382_v10, 1 }
  0x24   : > { %v401_v20 = vor.u32 %v400_v13, %v372_v6 }
  0x25   : > { %1143 = vmatpush3.bf16.msra.mxu0 %v1238_v22  ;;  %v395_v21 = vsel %vm1391_vm2, 0, %v384_v17  ;;  %v403_v33 = vor.u32 %v402_v30, %v379_v9 }
  0x26   : > { %1167 = vmatpush3.bf16.msra.mxu1 %v1239_v25  ;;  %1144 = vmatprep.subr.bf16.mxu0 %v1240_v31  ;;  %v413_v25 = vsel %vm1418_vm5, %v401_v20, 0 }
  0x27   : > { %1168 = vmatprep.subr.bf16.mxu1 %v1241_v41  ;;  %v414_v35 = vsel %vm1418_vm5, %v403_v33, 0 }
  0x29   : > { %1145 = vmatpush3.bf16.msra.mxu0 %v1240_v31  ;;  %v1249_v31 = vld [vmem:[%s1467_s3] sm:$0xff]  }
  0x2a   : > { %1169 = vmatpush3.bf16.msra.mxu1 %v1241_v41  ;;  %1178 = vmatprep.subr.bf16.mxu0 %v1242_v54 }
  0x2b   : > { %1202 = vmatprep.subr.bf16.mxu1 %v1242_v54 }
  0x2c   : > { %1147 = vmatmul.mubr.bf16.vlgmr.msra.gmra.mxu0 %v393_v8 }
  0x2d   : > { %1171 = vmatmul.mubr.bf16.vlgmr.msra.gmra.mxu1 %v1379_v45  ;;  %1179 = vmatpush3.bf16.msra.mxu0 %v1242_v54 }
  0x2e   : > { %1210 = vmatpush3.bf16.msra.mxu1 %v1242_v54  ;;  %1180 = vmatprep.subr.bf16.mxu0 %v1243_v5 }
  0x2f   : > { %1203 = vmatprep.subr.bf16.mxu1 %v1243_v5  ;;  %1174 = vmatprep.mubr.bf16.mxu1 %v355_v1 }
  0x30   : > { %1150 = vmatprep.mubr.bf16.mxu0 %v394_v18 }
  0x31   : > { %1181 = vmatpush3.bf16.msra.mxu0 %v1243_v5 }
  0x32   : > { %1211 = vmatpush3.bf16.msra.mxu1 %v1243_v5  ;;  %1182 = vmatprep.subr.bf16.mxu0 %v1244_v15 }
  0x33   : > { %1204 = vmatprep.subr.bf16.mxu1 %v1244_v15 }
  0x34   : > { %1151 = vmatmul.mubr.bf16.gmra.mxu0 %v395_v21 }
  0x35   : > { %1175 = vmatmul.mubr.bf16.gmra.mxu1 %v1399_v3  ;;  %1183 = vmatpush3.bf16.msra.mxu0 %v1244_v15 }
  0x36   : > { %1212 = vmatpush3.bf16.msra.mxu1 %v1244_v15  ;;  %1184 = vmatprep.subr.bf16.mxu0 %v1245_v23 }
  0x37   : > { %1205 = vmatprep.subr.bf16.mxu1 %v1245_v23  ;;  %1194 = vmatprep.mubr.bf16.mxu0 %v411_v24 }
  0x38   : > { %1198 = vmatprep.mubr.bf16.mxu1 %v413_v25 }
  0x39   : > { %1185 = vmatpush3.bf16.msra.mxu0 %v1245_v23 }
  0x3a   : > { %1213 = vmatpush3.bf16.msra.mxu1 %v1245_v23  ;;  %1186 = vmatprep.subr.bf16.mxu0 %v1246_v26 }
  0x3b   : > { %1206 = vmatprep.subr.bf16.mxu1 %v1246_v26 }
  0x3d   : > { %1187 = vmatpush3.bf16.msra.mxu0 %v1246_v26 }
  0x3e   : > { %1214 = vmatpush3.bf16.msra.mxu1 %v1246_v26  ;;  %1188 = vmatprep.subr.bf16.mxu0 %v1247_v27 }
  0x3f   : > { %1207 = vmatprep.subr.bf16.mxu1 %v1247_v27 }
  0x41   : > { %1189 = vmatpush3.bf16.msra.mxu0 %v1247_v27 }
  0x42   : > { %1215 = vmatpush3.bf16.msra.mxu1 %v1247_v27  ;;  %1190 = vmatprep.subr.bf16.mxu0 %v1248_v28 }
  0x43   : > { %1208 = vmatprep.subr.bf16.mxu1 %v1248_v28 }
  0x45   : > { %1191 = vmatpush3.bf16.msra.mxu0 %v1248_v28 }
  0x46   : > { %1216 = vmatpush3.bf16.msra.mxu1 %v1248_v28  ;;  %1192 = vmatprep.subr.bf16.mxu0 %v1249_v31 }
  0x47   : > { %1209 = vmatprep.subr.bf16.mxu1 %v1249_v31 }
  0x49   : > { %1193 = vmatpush3.bf16.msra.mxu0 %v1249_v31 }
  0x4a   : > { %1217 = vmatpush3.bf16.msra.mxu1 %v1249_v31 }
  0x4c   : > { %1195 = vmatmul.mubr.bf16.vlgmr.msra.gmra.mxu0 %v412_v34 }
  0x4d   : > { %1199 = vmatmul.mubr.bf16.vlgmr.msra.gmra.mxu1 %v414_v35 }
  0xec   : > { %v1148_v36 = vpop.f32.mrf.mxu0 }
  0xed   : > { %v1172_v37 = vpop.f32.mrf.mxu1 }
  0xee   : > { %v529_v38 = vpop.f32.mrf.mxu0  ;;  %v651_v60 = vadd.f32 %v1172_v37, %v1148_v36 }
  0xef   : > { %v642_v39 = vpop.f32.mrf.mxu1 }
  0xf0   : > { %v1149_v40 = vpop.f32.mrf.mxu0  ;;  %v643_v61 = vadd.f32 %v642_v39, %v529_v38 }
  0xf1   : > { %v1173_v41 = vpop.f32.mrf.mxu1 }
  0xf2   : > { %v532_v42 = vpop.f32.mrf.mxu0  ;;  %v654_v56 = vadd.f32 %v1173_v41, %v1149_v40 }
  0xf3   : > { %v645_v43 = vpop.f32.mrf.mxu1 }
  0xf4   : > { %v1152_v44 = vpop.f32.mrf.mxu0  ;;  %v646_v59 = vadd.f32 %v645_v43, %v532_v42 }
  0xf5   : > { %v1176_v45 = vpop.f32.mrf.mxu1 }
  0xf6   : > { %v545_v46 = vpop.f32.mrf.mxu0  ;;  %v667_v8 = vadd.f32 %v1176_v45, %v1152_v44 }
  0xf7   : > { %v658_v47 = vpop.f32.mrf.mxu1 }
  0xf8   : > { %v1153_v48 = vpop.f32.mrf.mxu0  ;;  %v659_v4 = vadd.f32 %v658_v47, %v545_v46 }
  0xf9   : > { %v1177_v49 = vpop.f32.mrf.mxu1 }
  0xfa   : > { %v548_v50 = vpop.f32.mrf.mxu0  ;;  %v670_v2 = vadd.f32 %v1177_v49, %v1153_v48 }
  0xfb   : > { %v661_v51 = vpop.f32.mrf.mxu1 }
  0xfc   : > { %v662_v62 = vadd.f32 %v661_v51, %v548_v50 }
 0x10c   : > { %v1196_v52 = vpop.f32.mrf.mxu0 }
 0x10d   : > { %v1200_v53 = vpop.f32.mrf.mxu1  ;;  %v804_v5 = vadd.f32 %v1196_v52, %v651_v60 }
 0x10e   : > { %v771_v54 = vpop.f32.mrf.mxu0  ;;  %v808_v13 = vadd.f32 %v1200_v53, %v667_v8 }
 0x10f   : > { %v787_v55 = vpop.f32.mrf.mxu1  ;;  %v802_v6 = vadd.f32 %v771_v54, %v643_v61 }
 0x110   : > { %v1197_v57 = vpop.f32.mrf.mxu0  ;;  %v806_v10 = vadd.f32 %v787_v55, %v659_v4 }
 0x111   : > { %v1201_v58 = vpop.f32.mrf.mxu1  ;;  %v805_v63 = vadd.f32 %v1197_v57, %v654_v56 }
 0x112   : > { %v774_v0 = vpop.f32.mrf.mxu0  ;;  %v809_v9 = vadd.f32 %v1201_v58, %v670_v2 }
 0x113   : > { %v790_v1 = vpop.f32.mrf.mxu1  ;;  %v803_v3 = vadd.f32 %v774_v0, %v646_v59  ;;  %v811_v11 = vpack.c.bf16 %v805_v63, %v804_v5 }
 0x114   : > { %v807_v7 = vadd.f32 %v790_v1, %v662_v62  ;;  %v813_v17 = vpack.c.bf16 %v809_v9, %v808_v13 }
 0x115   : > { %v810_v12 = vpack.c.bf16 %v803_v3, %v802_v6  ;;  %1091 = vst [vmem:[%s292_s26 + $0x8] sm:$0xff] %v811_v11   ;;  %v852_v18 = vunpack.c.l.bf16 %v811_v11  ;;  %v853_v20 = vunpack.c.h.bf16 %v811_v11 }
 0x116   : > { %v812_v16 = vpack.c.bf16 %v807_v7, %v806_v10  ;;  %1093 = vst [vmem:[%s292_s26 + $0x18] sm:$0xff] %v813_v17   ;;  %v856_v26 = vunpack.c.l.bf16 %v813_v17  ;;  %v857_v28 = vunpack.c.h.bf16 %v813_v17 }
 0x117   : > { %1072 = vst [vmem:[%s292_s26] sm:$0xff] %v810_v12   ;;  %v850_v14 = vunpack.c.l.bf16 %v810_v12  ;;  %v851_v15 = vunpack.c.h.bf16 %v810_v12 }
 0x118   : > { %1092 = vst [vmem:[%s292_s26 + $0x10] sm:$0xff] %v812_v16   ;;  %v854_v22 = vunpack.c.l.bf16 %v812_v16  ;;  %v855_v24 = vunpack.c.h.bf16 %v812_v16 }
 0x119   : > { %v858_v19 = vadd.f32 %v851_v15, %v850_v14 }
 0x11b   : > { %v859_v21 = vadd.f32 %v858_v19, %v852_v18 }
 0x11d   : > { %v860_v23 = vadd.f32 %v859_v21, %v853_v20 }
 0x11f   : > { %v861_v25 = vadd.f32 %v860_v23, %v854_v22 }
 0x121   : > { %v862_v27 = vadd.f32 %v861_v25, %v855_v24 }
 0x123   : > { %v863_v29 = vadd.f32 %v862_v27, %v856_v26 }
 0x125   : > { %v864_v30 = vadd.f32 %v863_v29, %v857_v28 }
 0x127   : > { %v865_v31 = vrot.slane %v864_v30, 4 }
 0x129   : > { %v866_v32 = vadd.f32 %v865_v31, %v864_v30 }
 0x12b   : > { %v867_v33 = vrot.slane %v866_v32, 2 }
 0x12d   : > { %v868_v34 = vadd.f32 %v867_v33, %v866_v32 }
 0x12f   : > { %v869_v35 = vrot.slane %v868_v34, 1 }
 0x131   : > { %v870_v36 = vadd.f32 %v869_v35, %v868_v34 }
 0x133   : > { %v872_v37 = vmul.f32 0.015625, %v870_v36 }
 0x135   : > { %v873_v38 = vsub.f32 %v850_v14, %v872_v37  ;;  %v874_v39 = vsub.f32 %v851_v15, %v872_v37  ;;  %v875_v40 = vsub.f32 %v852_v18, %v872_v37  ;;  %v876_v41 = vsub.f32 %v853_v20, %v872_v37 }
 0x136   : > { %v877_v44 = vsub.f32 %v854_v22, %v872_v37  ;;  %v878_v47 = vsub.f32 %v855_v24, %v872_v37  ;;  %v879_v50 = vsub.f32 %v856_v26, %v872_v37  ;;  %v880_v53 = vsub.f32 %v857_v28, %v872_v37 }
 0x137   : > { %v881_v42 = vmul.f32 %v873_v38, %v873_v38  ;;  %v882_v43 = vmul.f32 %v874_v39, %v874_v39  ;;  %v883_v45 = vmul.f32 %v875_v40, %v875_v40  ;;  %v884_v48 = vmul.f32 %v876_v41, %v876_v41 }
 0x138   : > { %v885_v51 = vmul.f32 %v877_v44, %v877_v44  ;;  %v886_v54 = vmul.f32 %v878_v47, %v878_v47  ;;  %v887_v56 = vmul.f32 %v879_v50, %v879_v50  ;;  %v888_v58 = vmul.f32 %v880_v53, %v880_v53 }
 0x139   : > { %v889_v46 = vadd.f32 %v882_v43, %v881_v42 }
 0x13b   : > { %v890_v49 = vadd.f32 %v889_v46, %v883_v45 }
 0x13d   : > { %v891_v52 = vadd.f32 %v890_v49, %v884_v48 }
 0x13f   : > { %v892_v55 = vadd.f32 %v891_v52, %v885_v51 }
 0x141   : > { %v893_v57 = vadd.f32 %v892_v55, %v886_v54 }
 0x143   : > { %v894_v59 = vadd.f32 %v893_v57, %v887_v56 }
 0x145   : > { %v895_v60 = vadd.f32 %v894_v59, %v888_v58 }
 0x147   : > { %v896_v61 = vrot.slane %v895_v60, 4 }
 0x149   : > { %v897_v62 = vadd.f32 %v896_v61, %v895_v60 }
 0x14b   : > { %v898_v63 = vrot.slane %v897_v62, 2 }
 0x14d   : > { %v899_v0 = vadd.f32 %v898_v63, %v897_v62 }
 0x14f   : > { %v900_v1 = vrot.slane %v899_v0, 1 }
 0x151   : > { %v901_v2 = vadd.f32 %v900_v1, %v899_v0 }
 0x153   : > { %v903_v3 = vsel %vm389_vm0, %v870_v36, %v901_v2 }
 0x154   : > { %904 = vst [vmem:[%s297_s29] sm:$0x3] %v903_v3 }
 0x155 PF: > { %s18_s24 = sadd.s32 1, %s1256_s24  }
 0x156   : > { %p15_p5 = scmp.ge.s32.totalorder %s18_s24, 4  }
 0x158   :  { %17 = sbr.rel (!%p15_p5) target bundleno = 1 (0x1), region = 86 }

// kernel: basic_block_1d.3
= control target key start
LH: loop header
LB: loop body
LE: loop exit
PB: predicated region body
PF: predicated region fallthrough
CT: control target
= control target key end

     0   :  { %s1526_s24 = smov 0   ;;  %s1816_s0 = inlined_call_operand.vmem [shape: bf16[8,16,128], index: 0, kind: input, shape index: {}]   ;;  %s1817_s1 = inlined_call_operand.vmem [shape: bf16[128,128], index: 1, kind: input, shape index: {}]   ;;  %s1818_s2 = inlined_call_operand.vmem [shape: bf16[128,256], index: 2, kind: input, shape index: {}]   ;;  %s1819_s3 = inlined_call_operand.vmem [shape: bf16[128,128], index: 3, kind: input, shape index: {}]   ;;  %s1820_s4 = inlined_call_operand.vmem [shape: bf16[8,16,128], index: 4, kind: output, shape index: {0}]   ;;  %s1821_s5 = inlined_call_operand.vmem [shape: f32[2,2,128], index: 5, kind: output, shape index: {1}]   ;;  %s1822_s6 = inlined_call_operand.vmem [shape: bf16[8,16,128], index: 6, kind: output, shape index: {2}]   ;;  %s1823_s7 = inlined_call_operand.vmem [shape: f32[2,2,128], index: 7, kind: output, shape index: {3}]  }
   0x1 LB: > { %s1532_s25 = sadd.s32 4294967295, %s1483_s24   ;;  %p1205_p0 = scmp.ge.s32.totalorder %s1483_s24, 1  ;;  %s1483_s24 = sphi %s1526_s24, %s18_s24  }
   0x2   : > { %p246_p1 = scmp.lt.s32.totalorder %s1483_s24, 3 }
   0x4   : > { %p247_p2 = pnand %p1205_p0, %p246_p1 }
   0x5   : > { %s1206_s9 = sshll.u32 (!%p247_p2), %s1532_s25, 2  ;;  %p308_p4 = scmp.lt.s32.totalorder (!%p247_p2), %s1532_s25, 1 }
   0x6   : > { %250 = sbr.rel (%p247_p2) target bundleno = 342 (0x156), region = 36  ;;  %p295_p3 = scmp.lt.s32.totalorder (!%p247_p2), %s1206_s9, 7 }
   0xb   : > { %v1433_v0 = vld [vmem:[%s1818_s2 + $0x74] ss:$8 sps:$4 sm:$0xff]   ;;  %v1485_v2 = vmov 0   ;;  %v1436_v3 = vld [vmem:[%s1818_s2 + $0x70] ss:$8 sps:$4 sm:$0xff]   ;;  %v1443_v8 = vld [vmem:[%s1817_s1 + $0x28] sm:$0xff]  }
   0xc   : > { %v1435_v1 = vld [vmem:[%s1817_s1 + $0x38] sm:$0xff]   ;;  %542 = vmatprep.mubr.bf16.mxu0 %v1485_v2  ;;  %510 = vmatprep.subr.bf16.mxu0 %v1433_v0  ;;  %v1437_v4 = vld [vmem:[%s1818_s2 + $0x64] ss:$8 sps:$4 sm:$0xff]   ;;  %v1439_v5 = vld [vmem:[%s1817_s1 + $0x30] sm:$0xff]   ;;  %s1829_s9 = smov (!%p295_p3, %s1206_s9), 7  ;;  %vm384_vm1 = vcmask 1040384  }
   0xd   : > { %1360 = vmatprep.subr.bf16.mxu1 %v1435_v1  ;;  %511 = vmatpush1.bf16.msra.mxu0 %v1436_v3  ;;  %v1440_v6 = vld [vmem:[%s1818_s2 + $0x60] ss:$8 sps:$4 sm:$0xff]   ;;  %v1441_v7 = vld [vmem:[%s1818_s2 + $0x54] ss:$8 sps:$4 sm:$0xff]   ;;  %v1444_v9 = vld [vmem:[%s1818_s2 + $0x50] ss:$8 sps:$4 sm:$0xff]  }
   0xe   : > { %1361 = vmatpush3.bf16.msra.mxu1 %v1435_v1  ;;  %512 = vmatprep.subr.bf16.mxu0 %v1437_v4  ;;  %v1445_v10 = vld [vmem:[%s1818_s2 + $0x44] ss:$8 sps:$4 sm:$0xff]   ;;  %v1448_v12 = vld [vmem:[%s1818_s2 + $0x40] ss:$8 sps:$4 sm:$0xff]   ;;  %v1449_v13 = vld [vmem:[%s1818_s2 + $0x34] ss:$8 sps:$4 sm:$0xff]  }
   0xf   : > { %1362 = vmatprep.subr.bf16.mxu1 %v1439_v5  ;;  %v1447_v11 = vld [vmem:[%s1817_s1 + $0x20] sm:$0xff]   ;;  %v1451_v14 = vld [vmem:[%s1817_s1 + $0x18] sm:$0xff]   ;;  %s1580_s12 = sshll.u32 %s1829_s9, 3  ;;  %v1455_v17 = vld [vmem:[%s1817_s1 + $0x10] sm:$0xff]   ;;  %vm385_vm0 = vsmask.f32 256 }
  0x10   : > { %v1452_v15 = vld [vmem:[%s1818_s2 + $0x30] ss:$8 sps:$4 sm:$0xff]   ;;  %v1453_v16 = vld [vmem:[%s1818_s2 + $0x24] ss:$8 sps:$4 sm:$0xff]   ;;  %s1592_s19 = scalar_lea.vmem %s1816_s0, %s1580_s12  ;;  %v1456_v18 = vld [vmem:[%s1818_s2 + $0x20] ss:$8 sps:$4 sm:$0xff]   ;;  %s1714_s14 = scalar_lea.vmem %s1822_s6, %s1580_s12 }
  0x11   : > { %513 = vmatpush1.bf16.msra.mxu0 %v1440_v6  ;;  %v1457_v19 = vld [vmem:[%s1818_s2 + $0x14] ss:$8 sps:$4 sm:$0xff]   ;;  %v1459_v20 = vld [vmem:[%s1817_s1 + $0x8] sm:$0xff]   ;;  %v1607_v21 = vld [vmem:[%s1592_s19] sm:$0xff]   ;;  %vm403_vm3 = vcmask 1047552   ;;  %s306_s17 = scalar_lea.vmem %s1820_s4, %s1580_s12  ;;  %s1831_s25 = smov (!%p308_p4, %s1532_s25), 1 }
  0x12   : > { %1363 = vmatpush3.bf16.msra.mxu1 %v1439_v5  ;;  %514 = vmatprep.subr.bf16.mxu0 %v1441_v7  ;;  %v1610_v22 = vld [vmem:[%s1592_s19 + $0x8] sm:$0xff]   ;;  %v353_v23 = vshrl.u32 %v1607_v21, 16  ;;  %v356_v24 = vshll.u32 %v1607_v21, 16  ;;  %v1460_v25 = vld [vmem:[%s1818_s2 + $0x10] ss:$8 sps:$4 sm:$0xff]   ;;  %vm1625_vm2 = vmand %vm384_vm1, %vm385_vm0  ;;  %s1212_s12 = sshll.u32 %s1831_s25, 1 }
  0x13   : > { %1364 = vmatprep.subr.bf16.mxu1 %v1443_v8  ;;  %v360_v26 = vshrl.u32 %v1610_v22, 16  ;;  %v1461_v27 = vld [vmem:[%s1818_s2 + $0x4] ss:$8 sps:$4 sm:$0xff]   ;;  %v363_v31 = vshll.u32 %v1610_v22, 16  ;;  %v1471_v34 = vld [vmem:[%s1592_s19 + $0x10] sm:$0xff]   ;;  %v1641_v36 = vld [vmem:[%s1592_s19 + $0x18] sm:$0xff]   ;;  %s322_s9 = scalar_lea.vmem %s1823_s7, %s1212_s12  ;;  %s311_s22 = scalar_lea.vmem %s1821_s5, %s1212_s12 }
  0x14   : > { %v355_v28 = vrot.slane %v353_v23, 7  ;;  %v1463_v32 = vld [vmem:[%s1817_s1] sm:$0xff]   ;;  %v367_v39 = vshrl.u32 %v1471_v34, 16  ;;  %v370_v40 = vshll.u32 %v1471_v34, 16  ;;  %v1467_v41 = vld [vmem:[%s1819_s3 + $0x38] sm:$0xff]   ;;  %v374_v42 = vshrl.u32 %v1641_v36, 16 }
  0x15   : > { %515 = vmatpush1.bf16.msra.mxu0 %v1444_v9  ;;  %v362_v30 = vrot.slane %v360_v26, 7  ;;  %v1464_v37 = vld [vmem:[%s1818_s2] ss:$8 sps:$4 sm:$0xff]   ;;  %v377_v47 = vshll.u32 %v1641_v36, 16  ;;  %v1468_v48 = vld [vmem:[%s1819_s3 + $0x30] sm:$0xff]   ;;  %v1473_v58 = vld [vmem:[%s1819_s3 + $0x18] sm:$0xff]  }
  0x16   : > { %1365 = vmatpush3.bf16.msra.mxu1 %v1443_v8  ;;  %516 = vmatprep.subr.bf16.mxu0 %v1445_v10  ;;  %v358_v33 = vor.u32 %v356_v24, %v355_v28  ;;  %v369_v43 = vrot.slane %v367_v39, 7  ;;  %v376_v46 = vrot.slane %v374_v42, 7  ;;  %v395_v50 = vrot.slane %v370_v40, 1  ;;  %v1469_v52 = vld [vmem:[%s1819_s3 + $0x28] sm:$0xff]   ;;  %v1470_v56 = vld [vmem:[%s1819_s3 + $0x20] sm:$0xff]   ;;  %v1474_v59 = vld [vmem:[%s1819_s3 + $0x10] sm:$0xff]  }
  0x17   : > { %1366 = vmatprep.subr.bf16.mxu1 %v1447_v11  ;;  %v365_v38 = vor.u32 %v363_v31, %v362_v30  ;;  %vm404_vm4 = vsmask.f32 7424  ;;  %v391_v60 = vrot.slane %v356_v24, 1  ;;  %v1475_v61 = vld [vmem:[%s1819_s3 + $0x8] sm:$0xff]   ;;  %v393_v63 = vrot.slane %v363_v31, 1  ;;  %v1476_v1 = vld [vmem:[%s1819_s3] sm:$0xff]  }
  0x18   : > { %v387_v35 = vsel %vm1625_vm2, 0, %v358_v33  ;;  %v372_v45 = vor.u32 %v370_v40, %v369_v43  ;;  %v379_v51 = vor.u32 %v377_v47, %v376_v46  ;;  %v396_v53 = vor.u32 %v395_v50, %v367_v39  ;;  %vm1669_vm5 = vmand %vm403_vm3, %vm404_vm4 }
  0x19   : > { %517 = vmatpush1.bf16.msra.mxu0 %v1448_v12  ;;  %1376 = vmatprep.mubr.bf16.mxu1 %v387_v35  ;;  %v388_v44 = vsel %vm1625_vm2, 0, %v365_v38  ;;  %v392_v62 = vor.u32 %v391_v60, %v353_v23  ;;  %v397_v0 = vrot.slane %v377_v47, 1  ;;  %v394_v3 = vor.u32 %v393_v63, %v360_v26 }
  0x1a   : > { %1367 = vmatpush3.bf16.msra.mxu1 %v1447_v11  ;;  %518 = vmatprep.subr.bf16.mxu0 %v1449_v13  ;;  %v389_v49 = vsel %vm1625_vm2, 0, %v372_v45  ;;  %v390_v54 = vsel %vm1625_vm2, 0, %v379_v51  ;;  %v408_v57 = vsel %vm1669_vm5, %v396_v53, 0 }
  0x1b   : > { %1368 = vmatprep.subr.bf16.mxu1 %v1451_v14  ;;  %v398_v4 = vor.u32 %v397_v0, %v374_v42  ;;  %v407_v5 = vsel %vm1669_vm5, %v394_v3, 0 }
  0x1d   : > { %519 = vmatpush1.bf16.msra.mxu0 %v1452_v15  ;;  %v409_v6 = vsel %vm1669_vm5, %v398_v4, 0 }
  0x1e   : > { %1369 = vmatpush3.bf16.msra.mxu1 %v1451_v14  ;;  %520 = vmatprep.subr.bf16.mxu0 %v1453_v16 }
  0x1f   : > { %1370 = vmatprep.subr.bf16.mxu1 %v1455_v17 }
  0x21   : > { %521 = vmatpush1.bf16.msra.mxu0 %v1456_v18 }
  0x22   : > { %1371 = vmatpush3.bf16.msra.mxu1 %v1455_v17  ;;  %522 = vmatprep.subr.bf16.mxu0 %v1457_v19 }
  0x23   : > { %1372 = vmatprep.subr.bf16.mxu1 %v1459_v20 }
  0x25   : > { %523 = vmatpush1.bf16.msra.mxu0 %v1460_v25 }
  0x26   : > { %1373 = vmatpush3.bf16.msra.mxu1 %v1459_v20  ;;  %524 = vmatprep.subr.bf16.mxu0 %v1461_v27 }
  0x27   : > { %1374 = vmatprep.subr.bf16.mxu1 %v1463_v32 }
  0x29   : > { %525 = vmatpush1.bf16.msra.mxu0 %v1464_v37 }
  0x2a   : > { %1375 = vmatpush3.bf16.msra.mxu1 %v1463_v32  ;;  %1384 = vmatprep.subr.bf16.mxu0 %v1467_v41 }
  0x2b   : > { %1408 = vmatprep.subr.bf16.mxu1 %v1467_v41 }
  0x2c   : > { %543 = vmatmul.mubr.bf16.vlgmr.msra.gmra.mxu0 %v1607_v21 }
  0x2d   : > { %1377 = vmatmul.mubr.bf16.vlgmr.msra.gmra.mxu1 %v388_v44  ;;  %1385 = vmatpush3.bf16.msra.mxu0 %v1467_v41 }
  0x2e   : > { %1416 = vmatpush3.bf16.msra.mxu1 %v1467_v41  ;;  %1386 = vmatprep.subr.bf16.mxu0 %v1468_v48 }
  0x2f   : > { %1409 = vmatprep.subr.bf16.mxu1 %v1468_v48  ;;  %552 = vmatprep.mubr.bf16.mxu0 %v1485_v2 }
  0x30   : > { %1380 = vmatprep.mubr.bf16.mxu1 %v389_v49 }
  0x31   : > { %1387 = vmatpush3.bf16.msra.mxu0 %v1468_v48 }
  0x32   : > { %1417 = vmatpush3.bf16.msra.mxu1 %v1468_v48  ;;  %1388 = vmatprep.subr.bf16.mxu0 %v1469_v52 }
  0x33   : > { %1410 = vmatprep.subr.bf16.mxu1 %v1469_v52 }
  0x34   : > { %553 = vmatmul.mubr.bf16.gmra.mxu0 %v1610_v22 }
  0x35   : > { %1381 = vmatmul.mubr.bf16.gmra.mxu1 %v390_v54  ;;  %1389 = vmatpush3.bf16.msra.mxu0 %v1469_v52 }
  0x36   : > { %1418 = vmatpush3.bf16.msra.mxu1 %v1469_v52  ;;  %1390 = vmatprep.subr.bf16.mxu0 %v1470_v56 }
  0x37   : > { %1411 = vmatprep.subr.bf16.mxu1 %v1470_v56  ;;  %562 = vmatprep.mubr.bf16.mxu0 %v1485_v2 }
  0x38   : > { %1404 = vmatprep.mubr.bf16.mxu1 %v408_v57 }
  0x39   : > { %1391 = vmatpush3.bf16.msra.mxu0 %v1470_v56 }
  0x3a   : > { %1419 = vmatpush3.bf16.msra.mxu1 %v1470_v56  ;;  %1392 = vmatprep.subr.bf16.mxu0 %v1473_v58 }
  0x3b   : > { %1412 = vmatprep.subr.bf16.mxu1 %v1473_v58 }
  0x3c   : > { %563 = vmatmul.mubr.bf16.gmra.mxu0 %v1471_v34 }
  0x3d   : > { %1393 = vmatpush3.bf16.msra.mxu0 %v1473_v58  ;;  %572 = vmatprep.mubr.bf16.mxu0 %v1485_v2  ;;  %v406_v2 = vsel %vm1669_vm5, %v392_v62, 0 }
  0x3e   : > { %1420 = vmatpush3.bf16.msra.mxu1 %v1473_v58  ;;  %1394 = vmatprep.subr.bf16.mxu0 %v1474_v59 }
  0x3f   : > { %1413 = vmatprep.subr.bf16.mxu1 %v1474_v59 }
  0x41   : > { %1395 = vmatpush3.bf16.msra.mxu0 %v1474_v59 }
  0x42   : > { %1421 = vmatpush3.bf16.msra.mxu1 %v1474_v59  ;;  %1396 = vmatprep.subr.bf16.mxu0 %v1475_v61 }
  0x43   : > { %1414 = vmatprep.subr.bf16.mxu1 %v1475_v61 }
  0x44   : > { %573 = vmatmul.mubr.bf16.gmra.mxu0 %v1641_v36 }
  0x45   : > { %1397 = vmatpush3.bf16.msra.mxu0 %v1475_v61  ;;  %1400 = vmatprep.mubr.bf16.mxu0 %v406_v2 }
  0x46   : > { %1422 = vmatpush3.bf16.msra.mxu1 %v1475_v61  ;;  %1398 = vmatprep.subr.bf16.mxu0 %v1476_v1 }
  0x47   : > { %1415 = vmatprep.subr.bf16.mxu1 %v1476_v1 }
  0x49   : > { %1399 = vmatpush3.bf16.msra.mxu0 %v1476_v1 }
  0x4a   : > { %1423 = vmatpush3.bf16.msra.mxu1 %v1476_v1 }
  0x4c   : > { %1401 = vmatmul.mubr.bf16.vlgmr.msra.gmra.mxu0 %v407_v5 }
  0x4d   : > { %1405 = vmatmul.mubr.bf16.vlgmr.msra.gmra.mxu1 %v409_v6 }
  0xec   : > { %v544_v7 = vpop.f32.mrf.mxu0 }
  0xed   : > { %v1378_v9 = vpop.f32.mrf.mxu1 }
  0xee   : > { %v546_v8 = vpop.f32.mrf.mxu0 }
  0xef   : > { %v681_v13 = vpop.f32.mrf.mxu1 }
  0xf0   : > { %v548_v10 = vpop.f32.mrf.mxu0  ;;  %v712_v58 = vadd.f32 %v681_v13, %v544_v7 }
  0xf1   : > { %v1379_v16 = vpop.f32.mrf.mxu1 }
  0xf2   : > { %v550_v11 = vpop.f32.mrf.mxu0 }
  0xf3   : > { %v1716_v12 = vpack.c.bf16 %v550_v11, %v546_v8  ;;  %v684_v20 = vpop.f32.mrf.mxu1 }
  0xf4   : > { %v554_v14 = vpop.f32.mrf.mxu0  ;;  %v713_v56 = vadd.f32 %v684_v20, %v548_v10 }
  0xf5   : > { %1314 = vst [vmem:[%s1714_s14] sm:$0xff] %v1716_v12   ;;  %v992_v22 = vunpack.c.l.bf16 %v1716_v12  ;;  %v993_v23 = vunpack.c.h.bf16 %v1716_v12  ;;  %v1382_v24 = vpop.f32.mrf.mxu1  ;;  %v714_v59 = vadd.f32 %v1378_v9, %v554_v14 }
  0xf6   : > { %v556_v15 = vpop.f32.mrf.mxu0 }
  0xf7   : > { %v1000_v28 = vadd.f32 %v993_v23, %v992_v22  ;;  %v697_v29 = vpop.f32.mrf.mxu1 }
  0xf8   : > { %v558_v17 = vpop.f32.mrf.mxu0 }
  0xf9   : > { %v1383_v36 = vpop.f32.mrf.mxu1  ;;  %v715_v53 = vadd.f32 %v1379_v16, %v558_v17 }
  0xfa   : > { %v560_v18 = vpop.f32.mrf.mxu0 }
  0xfb   : > { %v1720_v19 = vpack.c.bf16 %v560_v18, %v556_v15  ;;  %v700_v41 = vpop.f32.mrf.mxu1 }
  0xfc   : > { %v564_v21 = vpop.f32.mrf.mxu0 }
  0xfd   : > { %1333 = vst [vmem:[%s1714_s14 + $0x8] sm:$0xff] %v1720_v19   ;;  %v994_v26 = vunpack.c.l.bf16 %v1720_v19  ;;  %v995_v34 = vunpack.c.h.bf16 %v1720_v19  ;;  %v716_v3 = vadd.f32 %v697_v29, %v564_v21 }
  0xfe   : > { %v566_v25 = vpop.f32.mrf.mxu0 }
  0xff   : > { %v1001_v31 = vadd.f32 %v1000_v28, %v994_v26 }
 0x100   : > { %v568_v27 = vpop.f32.mrf.mxu0 }
 0x101   : > { %v1002_v38 = vadd.f32 %v1001_v31, %v995_v34  ;;  %v717_v60 = vadd.f32 %v700_v41, %v568_v27 }
 0x102   : > { %v570_v30 = vpop.f32.mrf.mxu0 }
 0x103   : > { %v1733_v32 = vpack.c.bf16 %v570_v30, %v566_v25 }
 0x104   : > { %v574_v33 = vpop.f32.mrf.mxu0 }
 0x105   : > { %1334 = vst [vmem:[%s1714_s14 + $0x10] sm:$0xff] %v1733_v32   ;;  %v996_v35 = vunpack.c.l.bf16 %v1733_v32  ;;  %v997_v43 = vunpack.c.h.bf16 %v1733_v32  ;;  %v718_v8 = vadd.f32 %v1382_v24, %v574_v33 }
 0x106   : > { %v576_v37 = vpop.f32.mrf.mxu0 }
 0x107   : > { %v1003_v40 = vadd.f32 %v1002_v38, %v996_v35 }
 0x108   : > { %v578_v39 = vpop.f32.mrf.mxu0 }
 0x109   : > { %v1004_v47 = vadd.f32 %v1003_v40, %v997_v43  ;;  %v719_v0 = vadd.f32 %v1383_v36, %v578_v39 }
 0x10a   : > { %v580_v42 = vpop.f32.mrf.mxu0 }
 0x10b   : > { %v1744_v44 = vpack.c.bf16 %v580_v42, %v576_v37 }
 0x10c   : > { %v1402_v45 = vpop.f32.mrf.mxu0 }
 0x10d   : > { %v1406_v46 = vpop.f32.mrf.mxu1  ;;  %1335 = vst [vmem:[%s1714_s14 + $0x18] sm:$0xff] %v1744_v44   ;;  %v998_v48 = vunpack.c.l.bf16 %v1744_v44  ;;  %v999_v51 = vunpack.c.h.bf16 %v1744_v44  ;;  %v851_v4 = vadd.f32 %v1402_v45, %v714_v59 }
 0x10e   : > { %v818_v49 = vpop.f32.mrf.mxu0  ;;  %v855_v15 = vadd.f32 %v1406_v46, %v718_v8 }
 0x10f   : > { %v834_v50 = vpop.f32.mrf.mxu1  ;;  %v1005_v52 = vadd.f32 %v1004_v47, %v998_v48  ;;  %v849_v5 = vadd.f32 %v818_v49, %v712_v58 }
 0x110   : > { %v1403_v54 = vpop.f32.mrf.mxu0  ;;  %v853_v7 = vadd.f32 %v834_v50, %v716_v3 }
 0x111   : > { %v1407_v55 = vpop.f32.mrf.mxu1  ;;  %v1006_v57 = vadd.f32 %v1005_v52, %v999_v51  ;;  %v852_v61 = vadd.f32 %v1403_v54, %v715_v53 }
 0x112   : > { %v821_v62 = vpop.f32.mrf.mxu0  ;;  %v856_v10 = vadd.f32 %v1407_v55, %v719_v0 }
 0x113   : > { %v837_v63 = vpop.f32.mrf.mxu1  ;;  %v1007_v1 = vrot.slane %v1006_v57, 4  ;;  %v850_v2 = vadd.f32 %v821_v62, %v713_v56  ;;  %v1760_v9 = vpack.c.bf16 %v852_v61, %v851_v4 }
 0x114   : > { %v854_v6 = vadd.f32 %v837_v63, %v717_v60  ;;  %v1769_v21 = vpack.c.bf16 %v856_v10, %v855_v15 }
 0x115   : > { %v1008_v11 = vadd.f32 %v1007_v1, %v1006_v57  ;;  %v1762_v13 = vpack.c.bf16 %v850_v2, %v849_v5  ;;  %1330 = vst [vmem:[%s306_s17 + $0x8] sm:$0xff] %v1760_v9   ;;  %v899_v24 = vunpack.c.l.bf16 %v1760_v9  ;;  %v900_v28 = vunpack.c.h.bf16 %v1760_v9 }
 0x116   : > { %v1767_v18 = vpack.c.bf16 %v854_v6, %v853_v7  ;;  %1332 = vst [vmem:[%s306_s17 + $0x18] sm:$0xff] %v1769_v21   ;;  %v903_v47 = vunpack.c.l.bf16 %v1769_v21 }
 0x117   : > { %v1009_v14 = vrot.slane %v1008_v11, 2  ;;  %1294 = vst [vmem:[%s306_s17] sm:$0xff] %v1762_v13   ;;  %v897_v16 = vunpack.c.l.bf16 %v1762_v13  ;;  %v898_v17 = vunpack.c.h.bf16 %v1762_v13 }
 0x118   : > { %1331 = vst [vmem:[%s306_s17 + $0x10] sm:$0xff] %v1767_v18   ;;  %v901_v36 = vunpack.c.l.bf16 %v1767_v18  ;;  %v902_v46 = vunpack.c.h.bf16 %v1767_v18 }
 0x119   : > { %v1010_v20 = vadd.f32 %v1009_v14, %v1008_v11  ;;  %v905_v25 = vadd.f32 %v898_v17, %v897_v16 }
 0x11b   : > { %v1011_v27 = vrot.slane %v1010_v20, 1  ;;  %v906_v29 = vadd.f32 %v905_v25, %v899_v24 }
 0x11d   : > { %v1012_v30 = vadd.f32 %v1011_v27, %v1010_v20  ;;  %v907_v31 = vadd.f32 %v906_v29, %v900_v28 }
 0x11f   : > { %v1013_v33 = vmul.f32 0.015625, %v1012_v30  ;;  %v908_v40 = vadd.f32 %v907_v31, %v901_v36 }
 0x121   : > { %v1014_v37 = vsub.f32 %v992_v22, %v1013_v33  ;;  %v1015_v38 = vsub.f32 %v993_v23, %v1013_v33  ;;  %v1016_v39 = vsub.f32 %v994_v26, %v1013_v33  ;;  %v1017_v41 = vsub.f32 %v995_v34, %v1013_v33 }
 0x122   : > { %v1018_v49 = vsub.f32 %v996_v35, %v1013_v33  ;;  %v909_v12 = vadd.f32 %v908_v40, %v902_v46  ;;  %v904_v23 = vunpack.c.h.bf16 %v1769_v21  ;;  %v1019_v26 = vsub.f32 %v997_v43, %v1013_v33 }
 0x123   : > { %v1022_v42 = vmul.f32 %v1014_v37, %v1014_v37  ;;  %v1023_v45 = vmul.f32 %v1015_v38, %v1015_v38  ;;  %v1024_v22 = vmul.f32 %v1016_v39, %v1016_v39  ;;  %v1025_v52 = vmul.f32 %v1017_v41, %v1017_v41 }
 0x124   : > { %v910_v34 = vadd.f32 %v909_v12, %v903_v47  ;;  %v1020_v53 = vsub.f32 %v998_v48, %v1013_v33  ;;  %v1026_v54 = vmul.f32 %v1018_v49, %v1018_v49  ;;  %v1021_v35 = vsub.f32 %v999_v51, %v1013_v33 }
 0x125   : > { %v1030_v50 = vadd.f32 %v1023_v45, %v1022_v42  ;;  %v1027_v57 = vmul.f32 %v1019_v26, %v1019_v26 }
 0x126   : > { %v911_v56 = vadd.f32 %v910_v34, %v904_v23  ;;  %v1028_v60 = vmul.f32 %v1020_v53, %v1020_v53  ;;  %v1029_v61 = vmul.f32 %v1021_v35, %v1021_v35 }
 0x127   : > { %v1031_v19 = vadd.f32 %v1030_v50, %v1024_v22 }
 0x128   : > { %v912_v59 = vrot.slane %v911_v56, 4 }
 0x129   : > { %v1032_v55 = vadd.f32 %v1031_v19, %v1025_v52 }
 0x12a   : > { %v913_v43 = vadd.f32 %v912_v59, %v911_v56 }
 0x12b   : > { %v1033_v58 = vadd.f32 %v1032_v55, %v1026_v54 }
 0x12c   : > { %v914_v63 = vrot.slane %v913_v43, 2 }
 0x12d   : > { %v1034_v32 = vadd.f32 %v1033_v58, %v1027_v57 }
 0x12e   : > { %v915_v1 = vadd.f32 %v914_v63, %v913_v43 }
 0x12f   : > { %v1035_v62 = vadd.f32 %v1034_v32, %v1028_v60 }
 0x130   : > { %v916_v2 = vrot.slane %v915_v1, 1 }
 0x131   : > { %v1036_v0 = vadd.f32 %v1035_v62, %v1029_v61 }
 0x132   : > { %v917_v4 = vadd.f32 %v916_v2, %v915_v1 }
 0x133   : > { %v1037_v48 = vrot.slane %v1036_v0, 4 }
 0x134   : > { %v919_v51 = vmul.f32 0.015625, %v917_v4 }
 0x135   : > { %v1038_v3 = vadd.f32 %v1037_v48, %v1036_v0 }
 0x136   : > { %v920_v6 = vsub.f32 %v897_v16, %v919_v51  ;;  %v921_v8 = vsub.f32 %v898_v17, %v919_v51  ;;  %v922_v11 = vsub.f32 %v899_v24, %v919_v51  ;;  %v923_v7 = vsub.f32 %v900_v28, %v919_v51 }
 0x137   : > { %v1039_v44 = vrot.slane %v1038_v3, 2  ;;  %v924_v15 = vsub.f32 %v901_v36, %v919_v51  ;;  %v925_v25 = vsub.f32 %v902_v46, %v919_v51  ;;  %v926_v24 = vsub.f32 %v903_v47, %v919_v51 }
 0x138   : > { %v928_v9 = vmul.f32 %v920_v6, %v920_v6  ;;  %v929_v13 = vmul.f32 %v921_v8, %v921_v8  ;;  %v930_v18 = vmul.f32 %v922_v11, %v922_v11  ;;  %v931_v16 = vmul.f32 %v923_v7, %v923_v7 }
 0x139   : > { %v1040_v5 = vadd.f32 %v1039_v44, %v1038_v3  ;;  %v932_v27 = vmul.f32 %v924_v15, %v924_v15  ;;  %v927_v29 = vsub.f32 %v904_v23, %v919_v51  ;;  %v933_v31 = vmul.f32 %v925_v25, %v925_v25 }
 0x13a   : > { %v936_v20 = vadd.f32 %v929_v13, %v928_v9  ;;  %v934_v37 = vmul.f32 %v926_v24, %v926_v24 }
 0x13b   : > { %v1041_v10 = vrot.slane %v1040_v5, 1  ;;  %v935_v39 = vmul.f32 %v927_v29, %v927_v29 }
 0x13c   : > { %v937_v17 = vadd.f32 %v936_v20, %v930_v18 }
 0x13d   : > { %v1042_v14 = vadd.f32 %v1041_v10, %v1040_v5 }
 0x13e   : > { %v938_v28 = vadd.f32 %v937_v17, %v931_v16 }
 0x13f   : > { %v1043_v21 = vsel %vm384_vm1, %v1012_v30, %v1042_v14 }
 0x140   : > { %1044 = vst [vmem:[%s322_s9] sm:$0x3] %v1043_v21  ;;  %v939_v33 = vadd.f32 %v938_v28, %v932_v27 }
 0x142   : > { %v940_v38 = vadd.f32 %v939_v33, %v933_v31 }
 0x144   : > { %v941_v40 = vadd.f32 %v940_v38, %v934_v37 }
 0x146   : > { %v942_v36 = vadd.f32 %v941_v40, %v935_v39 }
 0x148   : > { %v943_v41 = vrot.slane %v942_v36, 4 }
 0x14a   : > { %v944_v42 = vadd.f32 %v943_v41, %v942_v36 }
 0x14c   : > { %v945_v45 = vrot.slane %v944_v42, 2 }
 0x14e   : > { %v946_v30 = vadd.f32 %v945_v45, %v944_v42 }
 0x150   : > { %v947_v46 = vrot.slane %v946_v30, 1 }
 0x152   : > { %v948_v47 = vadd.f32 %v947_v46, %v946_v30 }
 0x154   : > { %v950_v49 = vsel %vm384_vm1, %v917_v4, %v948_v47 }
 0x155   : > { %951 = vst [vmem:[%s311_s22] sm:$0x3] %v950_v49 }
 0x156 PF: > { %s18_s24 = sadd.s32 1, %s1483_s24  }
 0x157   : > { %p15_p5 = scmp.ge.s32.totalorder %s18_s24, 4  }
 0x159   :  { %17 = sbr.rel (!%p15_p5) target bundleno = 1 (0x1), region = 102 }

</bundles_post_ra>
